<compile_context>
chip_gen: v7x
topology: tpu7x:2x2x1
jax: 0.10.0
libtpu: 0.0.40
codegen_flags: <defaults>
</compile_context>

<pallas_src>
import functools

import jax
import jax.numpy as jnp
from jax.experimental import pallas as pl
from jax.experimental.pallas import tpu as pltpu

LANE = 128  # TPU lane width


def _round_up(n, m):
    return ((n + m - 1) // m) * m


def _pick_batch_tile(B):
    """Rows per grid step. Avoids padded rows for tiny batches, splits mid-size
    batches into >= 2 tiles (so v7x's two TensorCores both participate), and uses
    big lane/sublane-dense tiles for large batches."""
    if B >= 512:
        return 256
    if B >= 256:
        return 128
    if B <= 16:
        return B                          # single block == full batch (always legal)
    return _round_up((B + 1) // 2, 16)    # ~two tiles, sublane aligned


def prepare_params(params):
    """One-time weight preprocessing (hoisted out of the per-forward-call path):
      * bf16 casts for all MXU operands, f32 biases reshaped to (1, N)
      * encoder mean/log_var projections fused into one Hd x MV slab
        (mean -> lanes [0,L), log_var -> lanes [L,2L), remaining lanes zero)
      * decoder fc1 rows duplicated: rows [0,L) == rows [L,2L) == Wd1, so the MXU
        sums the mean-lane and (eps*std)-lane contributions of the packed z slab.
    """
    (w1, b1, wm, bm, wv, bv, wd1, bd1, wd2, bd2) = params
    D, Hd = w1.shape
    L = wm.shape[1]
    MV = _round_up(2 * L, LANE)

    wmv = jnp.pad(jnp.concatenate([wm, wv], axis=1),
                  ((0, 0), (0, MV - 2 * L))).astype(jnp.bfloat16)
    bmv = jnp.pad(jnp.concatenate([bm.reshape(1, -1), bv.reshape(1, -1)], axis=1),
                  ((0, 0), (0, MV - 2 * L))).astype(jnp.float32)
    wd1_packed = jnp.pad(jnp.concatenate([wd1, wd1], axis=0),
                         ((0, MV - 2 * L), (0, 0))).astype(jnp.bfloat16)

    return dict(
        w1=w1.astype(jnp.bfloat16), b1=b1.reshape(1, -1).astype(jnp.float32),
        wmv=wmv, bmv=bmv,
        wd1=wd1_packed, bd1=bd1.reshape(1, -1).astype(jnp.float32),
        wd2=wd2.astype(jnp.bfloat16), bd2=bd2.reshape(1, -1).astype(jnp.float32),
        in_dim=D, hidden=Hd, latent=L, mv_width=MV,
    )


def vae_forward_kernel(x_ref, eps_ref,
                       w1_ref, b1_ref, wmv_ref, bmv_ref,
                       wd1_ref, bd1_ref, wd2_ref, bd2_ref,
                       xhat_ref, mv_ref, *, latent_dim):
    L = latent_dim

    # ---- encoder hidden: h = relu(x @ W1 + b1) (bf16 MXU operands, f32 accumulate) ----
    h = jnp.dot(x_ref[...], w1_ref[...],
                preferred_element_type=jnp.float32) + b1_ref[...]
    h = jnp.maximum(h, 0.0)

    # ---- fused mean|log_var slab: lanes [0,L)=mean, [L,2L)=log_var, rest 0 ----
    mv = jnp.dot(h.astype(jnp.bfloat16), wmv_ref[...],
                 preferred_element_type=jnp.float32) + bmv_ref[...]
    mv_ref[...] = mv

    # ---- reparameterization without any cross-lane moves ----
    # eps is staged in lanes [L,2L); std outside that band is exp(0)=1 and gets
    # multiplied by eps=0, so no alignment roll is needed and no inf*0 can occur.
    lane = jax.lax.broadcasted_iota(jnp.int32, mv.shape, dimension=1)
    lv_band = (lane >= L) & (lane < 2 * L)
    std = jnp.exp(0.5 * jnp.where(lv_band, mv, 0.0))           # exp -> EUP
    z_slab = jnp.where(lane < L, mv, 0.0) + eps_ref[...].astype(jnp.float32) * std

    # ---- decoder (Bernoulli MLP): duplicated fc1 rows make the MXU add mean + eps*std ----
    h2 = jnp.dot(z_slab.astype(jnp.bfloat16), wd1_ref[...],
                 preferred_element_type=jnp.float32) + bd1_ref[...]
    h2 = jnp.maximum(h2, 0.0)
    logits = jnp.dot(h2.astype(jnp.bfloat16), wd2_ref[...],
                     preferred_element_type=jnp.float32) + bd2_ref[...]

    # sigmoid = 1 / (1 + exp(-x)): exp and approx reciprocal both run on the EUP slot.
    xhat = pl.reciprocal(1.0 + jnp.exp(-logits), approx=True)
    xhat_ref[...] = xhat.astype(xhat_ref.dtype)


def vae_forward(x_nchw, eps, prepared, *, xhat_dtype=jnp.bfloat16):
    """x_nchw: (B, C, H, W) float32; eps: (B, latent) float32; prepared: prepare_params(...)."""
    B = x_nchw.shape[0]
    D, Hd = prepared["in_dim"], prepared["hidden"]
    L, MV = prepared["latent"], prepared["mv_width"]
    assert x_nchw.shape[1] * x_nchw.shape[2] * x_nchw.shape[3] == D
    assert eps.shape == (B, L)

    tile = _pick_batch_tile(B)
    grid_b = pl.cdiv(B, tile)

    # per-call staging only: flatten NCHW (== x.view(B, -1)) to bf16, and place eps
    # in lanes [L, 2L) of the packed latent slab (bf16 -> half the eps DMA bytes).
    x_flat = x_nchw.reshape(B, D).astype(jnp.bfloat16)
    eps_p = jnp.pad(eps.astype(jnp.bfloat16), ((0, 0), (L, MV - 2 * L)))

    flops = int(2 * B * (D * Hd + Hd * MV + MV * Hd + Hd * D))
    transcendentals = int(B * (MV + 2 * D))
    bytes_accessed = int(
        B * D * 2 + B * MV * 2                                  # x, eps (bf16)
        + (D * Hd + Hd * MV + MV * Hd + Hd * D) * 2             # bf16 weights
        + (Hd + MV + Hd + D) * 4                                # f32 biases
        + B * D * 2 + B * MV * 4)                               # x_hat (bf16), mv (f32)

    kernel = functools.partial(vae_forward_kernel, latent_dim=L)

    def row_map(i):
        return (i, 0)

    def const_map(i):
        return (0, 0)

    def run(weight_mode):
        def resident(shape):
            if weight_mode is None:
                return pl.BlockSpec(shape, const_map)
            return pl.BlockSpec(shape, const_map, pipeline_mode=weight_mode)

        return pl.pallas_call(
            kernel,
            grid=(grid_b,),
            out_shape=(
                jax.ShapeDtypeStruct((B, D), xhat_dtype),       # x_hat
                jax.ShapeDtypeStruct((B, MV), jnp.float32),     # packed mean|log_var
            ),
            in_specs=[
                pl.BlockSpec((tile, D), row_map),               # x tile
                pl.BlockSpec((tile, MV), row_map),              # eps tile
                resident((D, Hd)), resident((1, Hd)),           # w1, b1
                resident((Hd, MV)), resident((1, MV)),          # wmv, bmv (fused)
                resident((MV, Hd)), resident((1, Hd)),          # wd1 (packed), bd1
                resident((Hd, D)), resident((1, D)),            # wd2, bd2
            ],
            out_specs=(
                pl.BlockSpec((tile, D), row_map),
                pl.BlockSpec((tile, MV), row_map),
            ),
            compiler_params=pltpu.CompilerParams(
                dimension_semantics=("parallel",)),
            cost_estimate=pl.CostEstimate(
                flops=flops, transcendentals=transcendentals,
                bytes_accessed=bytes_accessed),
        )(x_flat, eps_p, prepared["w1"], prepared["b1"], prepared["wmv"],
          prepared["bmv"], prepared["wd1"], prepared["bd1"], prepared["wd2"],
          prepared["bd2"])

    try:
        # Resident (constant index_map) weights never re-fetch: single-buffer them.
        xhat, mv = run(pl.Buffered(1))
    except Exception:
        # Fallback for jax builds that reject single-buffered pipeline_mode.
        xhat, mv = run(None)

    mean = mv[:, :L]
    log_var = mv[:, L:2 * L]
    return xhat, mean, log_var


def init_params(key, in_dim, hidden_dim, latent_dim):
    """Deterministic PyTorch-Linear-style init (uniform +/- 1/sqrt(fan_in))."""
    ks = jax.random.split(key, 10)

    def lin(kw, kb, fan_in, fan_out):
        bound = 1.0 / jnp.sqrt(fan_in)
        w = jax.random.uniform(kw, (fan_in, fan_out), jnp.float32, -bound, bound)
        b = jax.random.uniform(kb, (1, fan_out), jnp.float32, -bound, bound)
        return w, b

    w1, b1 = lin(ks[0], ks[1], in_dim, hidden_dim)        # encoder fc1
    wm, bm = lin(ks[2], ks[3], hidden_dim, latent_dim)    # encoder fc2_mean
    wv, bv = lin(ks[4], ks[5], hidden_dim, latent_dim)    # encoder fc2_logvar
    wd1, bd1 = lin(ks[6], ks[7], latent_dim, hidden_dim)  # decoder fc1
    wd2, bd2 = lin(ks[8], ks[9], hidden_dim, in_dim)      # decoder fc2
    return (w1, b1, wm, bm, wv, bv, wd1, bd1, wd2, bd2)


def vae_forward_ref(x_nchw, eps, params):
    """Pure-JAX f32 reference for correctness checking."""
    B = x_nchw.shape[0]
    x = x_nchw.reshape(B, -1)
    (w1, b1, wm, bm, wv, bv, wd1, bd1, wd2, bd2) = params
    h = jnp.maximum(x @ w1 + b1, 0.0)
    mean = h @ wm + bm
    log_var = h @ wv + bv
    z = mean + eps * jnp.exp(0.5 * log_var)
    h2 = jnp.maximum(z @ wd1 + bd1, 0.0)
    x_hat = jax.nn.sigmoid(h2 @ wd2 + bd2)
    return x_hat, mean, log_var


if __name__ == "__main__":
    # Small shapes: batch=8, single-channel 16x16 images -> in_dim=256,
    # hidden=128, latent=32 (packed with log_var into one 128-lane slab).
    B, C, H, W = 8, 1, 16, 16
    IN_DIM = C * H * W
    HIDDEN = 128
    LATENT = 32

    key = jax.random.PRNGKey(0)
    k_x, k_eps, k_params = jax.random.split(key, 3)

    x = jax.random.uniform(k_x, (B, C, H, W), jnp.float32)      # image-like input
    eps = jax.random.normal(k_eps, (B, LATENT), jnp.float32)    # reparam noise
    params = init_params(k_params, IN_DIM, HIDDEN, LATENT)

    prepared = prepare_params(params)   # one-time weight prep (hoisted out of forward)
    x_hat, mean, log_var = vae_forward(x, eps, prepared)
    jax.block_until_ready((x_hat, mean, log_var))

    # correctness check vs pure-f32 reference (bf16 MXU operands / bf16 x_hat loosen tol)
    x_hat_r, mean_r, log_var_r = vae_forward_ref(x, eps, params)
    assert x_hat.shape == (B, IN_DIM)
    assert mean.shape == (B, LATENT) and log_var.shape == (B, LATENT)
    assert jnp.allclose(x_hat.astype(jnp.float32), x_hat_r, atol=2e-2), "x_hat mismatch"
    assert jnp.allclose(mean, mean_r, atol=2e-2), "mean mismatch"
    assert jnp.allclose(log_var, log_var_r, atol=2e-2), "log_var mismatch"

    print("KERNEL_OK")
</pallas_src>

<mosaic_0001>
module attributes {stable_mosaic.version = 11 : i64} {
  func.func @vae_forward_kernel(%arg0: i32, %arg1: memref<8x256xbf16, #tpu.memory_space<vmem>>, %arg2: memref<8x128xbf16, #tpu.memory_space<vmem>>, %arg3: memref<256x128xbf16, #tpu.memory_space<vmem>>, %arg4: memref<1x128xf32, #tpu.memory_space<vmem>>, %arg5: memref<128x128xbf16, #tpu.memory_space<vmem>>, %arg6: memref<1x128xf32, #tpu.memory_space<vmem>>, %arg7: memref<128x128xbf16, #tpu.memory_space<vmem>>, %arg8: memref<1x128xf32, #tpu.memory_space<vmem>>, %arg9: memref<128x256xbf16, #tpu.memory_space<vmem>>, %arg10: memref<1x256xf32, #tpu.memory_space<vmem>>, %arg11: memref<8x256xbf16, #tpu.memory_space<vmem>>, %arg12: memref<8x128xf32, #tpu.memory_space<vmem>>) attributes {dimension_semantics = [#tpu.dimension_semantics<parallel>], iteration_bounds = array<i64: 1>, scalar_prefetch = 0 : i64, scratch_operands = 0 : i64, tpu.core_type = #tpu.core_type<tc>, window_params = [{transform_indices = @transform_0, window_bounds = array<i64: 8, 256>}, {transform_indices = @transform_1, window_bounds = array<i64: 8, 128>}, {pipeline_mode = #tpu.pipeline_mode<synchronous>, transform_indices = @transform_2, window_bounds = array<i64: 256, 128>}, {pipeline_mode = #tpu.pipeline_mode<synchronous>, transform_indices = @transform_3, window_bounds = array<i64: 1, 128>}, {pipeline_mode = #tpu.pipeline_mode<synchronous>, transform_indices = @transform_4, window_bounds = array<i64: 128, 128>}, {pipeline_mode = #tpu.pipeline_mode<synchronous>, transform_indices = @transform_5, window_bounds = array<i64: 1, 128>}, {pipeline_mode = #tpu.pipeline_mode<synchronous>, transform_indices = @transform_6, window_bounds = array<i64: 128, 128>}, {pipeline_mode = #tpu.pipeline_mode<synchronous>, transform_indices = @transform_7, window_bounds = array<i64: 1, 128>}, {pipeline_mode = #tpu.pipeline_mode<synchronous>, transform_indices = @transform_8, window_bounds = array<i64: 128, 256>}, {pipeline_mode = #tpu.pipeline_mode<synchronous>, transform_indices = @transform_9, window_bounds = array<i64: 1, 256>}, {transform_indices = @transform_10, window_bounds = array<i64: 8, 256>}, {transform_indices = @transform_11, window_bounds = array<i64: 8, 128>}]} {
    %c0 = arith.constant 0 : index
    %c0_0 = arith.constant 0 : index
    %0 = vector.load %arg1[%c0, %c0_0] : memref<8x256xbf16, #tpu.memory_space<vmem>>, vector<8x256xbf16>
    %c0_1 = arith.constant 0 : index
    %c0_2 = arith.constant 0 : index
    %1 = vector.load %arg3[%c0_1, %c0_2] : memref<256x128xbf16, #tpu.memory_space<vmem>>, vector<256x128xbf16>
    %cst = arith.constant dense<0.000000e+00> : vector<8x128xf32>
    %2 = tpu.matmul %0, %1, %cst {dimension_numbers = #tpu.dot_dimension_numbers<[1], [0], [0], [1], [0, 0, 1, 1], [], []>} : vector<8x256xbf16>, vector<256x128xbf16>, vector<8x128xf32> -> vector<8x128xf32>
    %c0_3 = arith.constant 0 : index
    %c0_4 = arith.constant 0 : index
    %3 = vector.load %arg4[%c0_3, %c0_4] : memref<1x128xf32, #tpu.memory_space<vmem>>, vector<1x128xf32>
    %4 = vector.broadcast %3 : vector<1x128xf32> to vector<8x128xf32>
    %5 = arith.addf %2, %4 : vector<8x128xf32>
    %cst_5 = arith.constant 0.000000e+00 : f32
    %6 = vector.broadcast %cst_5 : f32 to vector<8x128xf32>
    %7 = arith.maximumf %5, %6 : vector<8x128xf32>
    %8 = arith.truncf %7 : vector<8x128xf32> to vector<8x128xbf16>
    %c0_6 = arith.constant 0 : index
    %c0_7 = arith.constant 0 : index
    %9 = vector.load %arg5[%c0_6, %c0_7] : memref<128x128xbf16, #tpu.memory_space<vmem>>, vector<128x128xbf16>
    %cst_8 = arith.constant dense<0.000000e+00> : vector<8x128xf32>
    %10 = tpu.matmul %8, %9, %cst_8 {dimension_numbers = #tpu.dot_dimension_numbers<[1], [0], [0], [1], [0, 0, 1, 1], [], []>} : vector<8x128xbf16>, vector<128x128xbf16>, vector<8x128xf32> -> vector<8x128xf32>
    %c0_9 = arith.constant 0 : index
    %c0_10 = arith.constant 0 : index
    %11 = vector.load %arg6[%c0_9, %c0_10] : memref<1x128xf32, #tpu.memory_space<vmem>>, vector<1x128xf32>
    %12 = vector.broadcast %11 : vector<1x128xf32> to vector<8x128xf32>
    %13 = arith.addf %10, %12 : vector<8x128xf32>
    %c0_11 = arith.constant 0 : index
    %c0_12 = arith.constant 0 : index
    %14 = vector.load %arg12[%c0_11, %c0_12] : memref<8x128xf32, #tpu.memory_space<vmem>>, vector<8x128xf32>
    tpu.vector_store %arg12[%c0_11, %c0_12], %13 {strides = array<i32>} : memref<8x128xf32, #tpu.memory_space<vmem>>, vector<8x128xf32>,
    %15 = tpu.iota {dimensions = array<i32: 1>} : vector<8x128xi32>
    %c32_i32 = arith.constant 32 : i32
    %16 = vector.broadcast %c32_i32 : i32 to vector<8x128xi32>
    %17 = arith.cmpi sge, %15, %16 : vector<8x128xi32>
    %c64_i32 = arith.constant 64 : i32
    %18 = vector.broadcast %c64_i32 : i32 to vector<8x128xi32>
    %19 = arith.cmpi slt, %15, %18 : vector<8x128xi32>
    %20 = arith.andi %17, %19 : vector<8x128xi1>
    %cst_13 = arith.constant 0.000000e+00 : f32
    %21 = vector.broadcast %cst_13 : f32 to vector<8x128xf32>
    %22 = arith.select %20, %13, %21 : vector<8x128xi1>, vector<8x128xf32>
    %cst_14 = arith.constant 5.000000e-01 : f32
    %23 = vector.broadcast %cst_14 : f32 to vector<8x128xf32>
    %24 = arith.mulf %23, %22 : vector<8x128xf32>
    %25 = math.exp %24 : vector<8x128xf32>
    %c32_i32_15 = arith.constant 32 : i32
    %26 = vector.broadcast %c32_i32_15 : i32 to vector<8x128xi32>
    %27 = arith.cmpi slt, %15, %26 : vector<8x128xi32>
    %cst_16 = arith.constant 0.000000e+00 : f32
    %28 = vector.broadcast %cst_16 : f32 to vector<8x128xf32>
    %29 = arith.select %27, %13, %28 : vector<8x128xi1>, vector<8x128xf32>
    %c0_17 = arith.constant 0 : index
    %c0_18 = arith.constant 0 : index
    %30 = vector.load %arg2[%c0_17, %c0_18] : memref<8x128xbf16, #tpu.memory_space<vmem>>, vector<8x128xbf16>
    %31 = arith.extf %30 : vector<8x128xbf16> to vector<8x128xf32>
    %32 = arith.mulf %31, %25 : vector<8x128xf32>
    %33 = arith.addf %29, %32 : vector<8x128xf32>
    %34 = arith.truncf %33 : vector<8x128xf32> to vector<8x128xbf16>
    %c0_19 = arith.constant 0 : index
    %c0_20 = arith.constant 0 : index
    %35 = vector.load %arg7[%c0_19, %c0_20] : memref<128x128xbf16, #tpu.memory_space<vmem>>, vector<128x128xbf16>
    %cst_21 = arith.constant dense<0.000000e+00> : vector<8x128xf32>
    %36 = tpu.matmul %34, %35, %cst_21 {dimension_numbers = #tpu.dot_dimension_numbers<[1], [0], [0], [1], [0, 0, 1, 1], [], []>} : vector<8x128xbf16>, vector<128x128xbf16>, vector<8x128xf32> -> vector<8x128xf32>
    %c0_22 = arith.constant 0 : index
    %c0_23 = arith.constant 0 : index
    %37 = vector.load %arg8[%c0_22, %c0_23] : memref<1x128xf32, #tpu.memory_space<vmem>>, vector<1x128xf32>
    %38 = vector.broadcast %37 : vector<1x128xf32> to vector<8x128xf32>
    %39 = arith.addf %36, %38 : vector<8x128xf32>
    %cst_24 = arith.constant 0.000000e+00 : f32
    %40 = vector.broadcast %cst_24 : f32 to vector<8x128xf32>
    %41 = arith.maximumf %39, %40 : vector<8x128xf32>
    %42 = arith.truncf %41 : vector<8x128xf32> to vector<8x128xbf16>
    %c0_25 = arith.constant 0 : index
    %c0_26 = arith.constant 0 : index
    %43 = vector.load %arg9[%c0_25, %c0_26] : memref<128x256xbf16, #tpu.memory_space<vmem>>, vector<128x256xbf16>
    %cst_27 = arith.constant dense<0.000000e+00> : vector<8x256xf32>
    %44 = tpu.matmul %42, %43, %cst_27 {dimension_numbers = #tpu.dot_dimension_numbers<[1], [0], [0], [1], [0, 0, 1, 1], [], []>} : vector<8x128xbf16>, vector<128x256xbf16>, vector<8x256xf32> -> vector<8x256xf32>
    %c0_28 = arith.constant 0 : index
    %c0_29 = arith.constant 0 : index
    %45 = vector.load %arg10[%c0_28, %c0_29] : memref<1x256xf32, #tpu.memory_space<vmem>>, vector<1x256xf32>
    %46 = vector.broadcast %45 : vector<1x256xf32> to vector<8x256xf32>
    %47 = arith.addf %44, %46 : vector<8x256xf32>
    %cst_30 = arith.constant 0.000000e+00 : f32
    %48 = vector.broadcast %cst_30 : f32 to vector<8x256xf32>
    %49 = arith.subf %48, %47 : vector<8x256xf32>
    %50 = math.exp %49 : vector<8x256xf32>
    %cst_31 = arith.constant 1.000000e+00 : f32
    %51 = vector.broadcast %cst_31 : f32 to vector<8x256xf32>
    %52 = arith.addf %51, %50 : vector<8x256xf32>
    %53 = tpu.reciprocal %52 {approx = true} : vector<8x256xf32> -> vector<8x256xf32>
    %54 = arith.truncf %53 : vector<8x256xf32> to vector<8x256xbf16>
    %c0_32 = arith.constant 0 : index
    %c0_33 = arith.constant 0 : index
    %55 = vector.load %arg11[%c0_32, %c0_33] : memref<8x256xbf16, #tpu.memory_space<vmem>>, vector<8x256xbf16>
    tpu.vector_store %arg11[%c0_32, %c0_33], %54 {strides = array<i32>} : memref<8x256xbf16, #tpu.memory_space<vmem>>, vector<8x256xbf16>,
    return
  }
  func.func @transform_0(%arg0: i32) -> (i32, i32) {
    %c0_i32 = arith.constant 0 : i32
    %c0_i32_0 = arith.constant 0 : i32
    return %arg0, %c0_i32 : i32, i32
  }
  func.func @transform_1(%arg0: i32) -> (i32, i32) {
    %c0_i32 = arith.constant 0 : i32
    %c0_i32_0 = arith.constant 0 : i32
    return %arg0, %c0_i32 : i32, i32
  }
  func.func @transform_2(%arg0: i32) -> (i32, i32) {
    %c0_i32 = arith.constant 0 : i32
    %c0_i32_0 = arith.constant 0 : i32
    %c0_i32_1 = arith.constant 0 : i32
    return %c0_i32, %c0_i32_0 : i32, i32
  }
  func.func @transform_3(%arg0: i32) -> (i32, i32) {
    %c0_i32 = arith.constant 0 : i32
    %c0_i32_0 = arith.constant 0 : i32
    %c0_i32_1 = arith.constant 0 : i32
    return %c0_i32, %c0_i32_0 : i32, i32
  }
  func.func @transform_4(%arg0: i32) -> (i32, i32) {
    %c0_i32 = arith.constant 0 : i32
    %c0_i32_0 = arith.constant 0 : i32
    %c0_i32_1 = arith.constant 0 : i32
    return %c0_i32, %c0_i32_0 : i32, i32
  }
  func.func @transform_5(%arg0: i32) -> (i32, i32) {
    %c0_i32 = arith.constant 0 : i32
    %c0_i32_0 = arith.constant 0 : i32
    %c0_i32_1 = arith.constant 0 : i32
    return %c0_i32, %c0_i32_0 : i32, i32
  }
  func.func @transform_6(%arg0: i32) -> (i32, i32) {
    %c0_i32 = arith.constant 0 : i32
    %c0_i32_0 = arith.constant 0 : i32
    %c0_i32_1 = arith.constant 0 : i32
    return %c0_i32, %c0_i32_0 : i32, i32
  }
  func.func @transform_7(%arg0: i32) -> (i32, i32) {
    %c0_i32 = arith.constant 0 : i32
    %c0_i32_0 = arith.constant 0 : i32
    %c0_i32_1 = arith.constant 0 : i32
    return %c0_i32, %c0_i32_0 : i32, i32
  }
  func.func @transform_8(%arg0: i32) -> (i32, i32) {
    %c0_i32 = arith.constant 0 : i32
    %c0_i32_0 = arith.constant 0 : i32
    %c0_i32_1 = arith.constant 0 : i32
    return %c0_i32, %c0_i32_0 : i32, i32
  }
  func.func @transform_9(%arg0: i32) -> (i32, i32) {
    %c0_i32 = arith.constant 0 : i32
    %c0_i32_0 = arith.constant 0 : i32
    %c0_i32_1 = arith.constant 0 : i32
    return %c0_i32, %c0_i32_0 : i32, i32
  }
  func.func @transform_10(%arg0: i32) -> (i32, i32) {
    %c0_i32 = arith.constant 0 : i32
    %c0_i32_0 = arith.constant 0 : i32
    return %arg0, %c0_i32 : i32, i32
  }
  func.func @transform_11(%arg0: i32) -> (i32, i32) {
    %c0_i32 = arith.constant 0 : i32
    %c0_i32_0 = arith.constant 0 : i32
    return %arg0, %c0_i32 : i32, i32
  }
}

module attributes {stable_mosaic.version = 11 : i64} {
  func.func @vae_forward_kernel(%arg0: i32, %arg1: memref<8x256xbf16, #tpu.memory_space<vmem>>, %arg2: memref<8x128xbf16, #tpu.memory_space<vmem>>, %arg3: memref<256x128xbf16, #tpu.memory_space<vmem>>, %arg4: memref<1x128xf32, #tpu.memory_space<vmem>>, %arg5: memref<128x128xbf16, #tpu.memory_space<vmem>>, %arg6: memref<1x128xf32, #tpu.memory_space<vmem>>, %arg7: memref<128x128xbf16, #tpu.memory_space<vmem>>, %arg8: memref<1x128xf32, #tpu.memory_space<vmem>>, %arg9: memref<128x256xbf16, #tpu.memory_space<vmem>>, %arg10: memref<1x256xf32, #tpu.memory_space<vmem>>, %arg11: memref<8x256xbf16, #tpu.memory_space<vmem>>, %arg12: memref<8x128xf32, #tpu.memory_space<vmem>>) attributes {dimension_semantics = [#tpu.dimension_semantics<parallel>], iteration_bounds = array<i64: 1>, scalar_prefetch = 0 : i64, scratch_operands = 0 : i64, tpu.core_type = #tpu.core_type<tc>, window_params = [{transform_indices = @transform_0, window_bounds = array<i64: 8, 256>}, {transform_indices = @transform_1, window_bounds = array<i64: 8, 128>}, {pipeline_mode = #tpu.pipeline_mode<synchronous>, transform_indices = @transform_2, window_bounds = array<i64: 256, 128>}, {pipeline_mode = #tpu.pipeline_mode<synchronous>, transform_indices = @transform_3, window_bounds = array<i64: 1, 128>}, {pipeline_mode = #tpu.pipeline_mode<synchronous>, transform_indices = @transform_4, window_bounds = array<i64: 128, 128>}, {pipeline_mode = #tpu.pipeline_mode<synchronous>, transform_indices = @transform_5, window_bounds = array<i64: 1, 128>}, {pipeline_mode = #tpu.pipeline_mode<synchronous>, transform_indices = @transform_6, window_bounds = array<i64: 128, 128>}, {pipeline_mode = #tpu.pipeline_mode<synchronous>, transform_indices = @transform_7, window_bounds = array<i64: 1, 128>}, {pipeline_mode = #tpu.pipeline_mode<synchronous>, transform_indices = @transform_8, window_bounds = array<i64: 128, 256>}, {pipeline_mode = #tpu.pipeline_mode<synchronous>, transform_indices = @transform_9, window_bounds = array<i64: 1, 256>}, {transform_indices = @transform_10, window_bounds = array<i64: 8, 256>}, {transform_indices = @transform_11, window_bounds = array<i64: 8, 128>}]} {
    %c0 = arith.constant 0 : index
    %c0_0 = arith.constant 0 : index
    %0 = vector.load %arg1[%c0, %c0_0] : memref<8x256xbf16, #tpu.memory_space<vmem>>, vector<8x256xbf16>
    %c0_1 = arith.constant 0 : index
    %c0_2 = arith.constant 0 : index
    %1 = vector.load %arg3[%c0_1, %c0_2] : memref<256x128xbf16, #tpu.memory_space<vmem>>, vector<256x128xbf16>
    %cst = arith.constant dense<0.000000e+00> : vector<8x128xf32>
    %2 = tpu.matmul %0, %1, %cst {dimension_numbers = #tpu.dot_dimension_numbers<[1], [0], [0], [1], [0, 0, 1, 1], [], []>} : vector<8x256xbf16>, vector<256x128xbf16>, vector<8x128xf32> -> vector<8x128xf32>
    %c0_3 = arith.constant 0 : index
    %c0_4 = arith.constant 0 : index
    %3 = vector.load %arg4[%c0_3, %c0_4] : memref<1x128xf32, #tpu.memory_space<vmem>>, vector<1x128xf32>
    %4 = vector.broadcast %3 : vector<1x128xf32> to vector<8x128xf32>
    %5 = arith.addf %2, %4 : vector<8x128xf32>
    %cst_5 = arith.constant 0.000000e+00 : f32
    %6 = vector.broadcast %cst_5 : f32 to vector<8x128xf32>
    %7 = arith.maximumf %5, %6 : vector<8x128xf32>
    %8 = arith.truncf %7 : vector<8x128xf32> to vector<8x128xbf16>
    %c0_6 = arith.constant 0 : index
    %c0_7 = arith.constant 0 : index
    %9 = vector.load %arg5[%c0_6, %c0_7] : memref<128x128xbf16, #tpu.memory_space<vmem>>, vector<128x128xbf16>
    %cst_8 = arith.constant dense<0.000000e+00> : vector<8x128xf32>
    %10 = tpu.matmul %8, %9, %cst_8 {dimension_numbers = #tpu.dot_dimension_numbers<[1], [0], [0], [1], [0, 0, 1, 1], [], []>} : vector<8x128xbf16>, vector<128x128xbf16>, vector<8x128xf32> -> vector<8x128xf32>
    %c0_9 = arith.constant 0 : index
    %c0_10 = arith.constant 0 : index
    %11 = vector.load %arg6[%c0_9, %c0_10] : memref<1x128xf32, #tpu.memory_space<vmem>>, vector<1x128xf32>
    %12 = vector.broadcast %11 : vector<1x128xf32> to vector<8x128xf32>
    %13 = arith.addf %10, %12 : vector<8x128xf32>
    %c0_11 = arith.constant 0 : index
    %c0_12 = arith.constant 0 : index
    %14 = vector.load %arg12[%c0_11, %c0_12] : memref<8x128xf32, #tpu.memory_space<vmem>>, vector<8x128xf32>
    tpu.vector_store %arg12[%c0_11, %c0_12], %13 {strides = array<i32>} : memref<8x128xf32, #tpu.memory_space<vmem>>, vector<8x128xf32>,
    %15 = tpu.iota {dimensions = array<i32: 1>} : vector<8x128xi32>
    %c32_i32 = arith.constant 32 : i32
    %16 = vector.broadcast %c32_i32 : i32 to vector<8x128xi32>
    %17 = arith.cmpi sge, %15, %16 : vector<8x128xi32>
    %c64_i32 = arith.constant 64 : i32
    %18 = vector.broadcast %c64_i32 : i32 to vector<8x128xi32>
    %19 = arith.cmpi slt, %15, %18 : vector<8x128xi32>
    %20 = arith.andi %17, %19 : vector<8x128xi1>
    %cst_13 = arith.constant 0.000000e+00 : f32
    %21 = vector.broadcast %cst_13 : f32 to vector<8x128xf32>
    %22 = arith.select %20, %13, %21 : vector<8x128xi1>, vector<8x128xf32>
    %cst_14 = arith.constant 5.000000e-01 : f32
    %23 = vector.broadcast %cst_14 : f32 to vector<8x128xf32>
    %24 = arith.mulf %23, %22 : vector<8x128xf32>
    %25 = math.exp %24 : vector<8x128xf32>
    %c32_i32_15 = arith.constant 32 : i32
    %26 = vector.broadcast %c32_i32_15 : i32 to vector<8x128xi32>
    %27 = arith.cmpi slt, %15, %26 : vector<8x128xi32>
    %cst_16 = arith.constant 0.000000e+00 : f32
    %28 = vector.broadcast %cst_16 : f32 to vector<8x128xf32>
    %29 = arith.select %27, %13, %28 : vector<8x128xi1>, vector<8x128xf32>
    %c0_17 = arith.constant 0 : index
    %c0_18 = arith.constant 0 : index
    %30 = vector.load %arg2[%c0_17, %c0_18] : memref<8x128xbf16, #tpu.memory_space<vmem>>, vector<8x128xbf16>
    %31 = arith.extf %30 : vector<8x128xbf16> to vector<8x128xf32>
    %32 = arith.mulf %31, %25 : vector<8x128xf32>
    %33 = arith.addf %29, %32 : vector<8x128xf32>
    %34 = arith.truncf %33 : vector<8x128xf32> to vector<8x128xbf16>
    %c0_19 = arith.constant 0 : index
    %c0_20 = arith.constant 0 : index
    %35 = vector.load %arg7[%c0_19, %c0_20] : memref<128x128xbf16, #tpu.memory_space<vmem>>, vector<128x128xbf16>
    %cst_21 = arith.constant dense<0.000000e+00> : vector<8x128xf32>
    %36 = tpu.matmul %34, %35, %cst_21 {dimension_numbers = #tpu.dot_dimension_numbers<[1], [0], [0], [1], [0, 0, 1, 1], [], []>} : vector<8x128xbf16>, vector<128x128xbf16>, vector<8x128xf32> -> vector<8x128xf32>
    %c0_22 = arith.constant 0 : index
    %c0_23 = arith.constant 0 : index
    %37 = vector.load %arg8[%c0_22, %c0_23] : memref<1x128xf32, #tpu.memory_space<vmem>>, vector<1x128xf32>
    %38 = vector.broadcast %37 : vector<1x128xf32> to vector<8x128xf32>
    %39 = arith.addf %36, %38 : vector<8x128xf32>
    %cst_24 = arith.constant 0.000000e+00 : f32
    %40 = vector.broadcast %cst_24 : f32 to vector<8x128xf32>
    %41 = arith.maximumf %39, %40 : vector<8x128xf32>
    %42 = arith.truncf %41 : vector<8x128xf32> to vector<8x128xbf16>
    %c0_25 = arith.constant 0 : index
    %c0_26 = arith.constant 0 : index
    %43 = vector.load %arg9[%c0_25, %c0_26] : memref<128x256xbf16, #tpu.memory_space<vmem>>, vector<128x256xbf16>
    %cst_27 = arith.constant dense<0.000000e+00> : vector<8x256xf32>
    %44 = tpu.matmul %42, %43, %cst_27 {dimension_numbers = #tpu.dot_dimension_numbers<[1], [0], [0], [1], [0, 0, 1, 1], [], []>} : vector<8x128xbf16>, vector<128x256xbf16>, vector<8x256xf32> -> vector<8x256xf32>
    %c0_28 = arith.constant 0 : index
    %c0_29 = arith.constant 0 : index
    %45 = vector.load %arg10[%c0_28, %c0_29] : memref<1x256xf32, #tpu.memory_space<vmem>>, vector<1x256xf32>
    %46 = vector.broadcast %45 : vector<1x256xf32> to vector<8x256xf32>
    %47 = arith.addf %44, %46 : vector<8x256xf32>
    %cst_30 = arith.constant 0.000000e+00 : f32
    %48 = vector.broadcast %cst_30 : f32 to vector<8x256xf32>
    %49 = arith.subf %48, %47 : vector<8x256xf32>
    %50 = math.exp %49 : vector<8x256xf32>
    %cst_31 = arith.constant 1.000000e+00 : f32
    %51 = vector.broadcast %cst_31 : f32 to vector<8x256xf32>
    %52 = arith.addf %51, %50 : vector<8x256xf32>
    %53 = tpu.reciprocal %52 {approx = true} : vector<8x256xf32> -> vector<8x256xf32>
    %54 = arith.truncf %53 : vector<8x256xf32> to vector<8x256xbf16>
    %c0_32 = arith.constant 0 : index
    %c0_33 = arith.constant 0 : index
    %55 = vector.load %arg11[%c0_32, %c0_33] : memref<8x256xbf16, #tpu.memory_space<vmem>>, vector<8x256xbf16>
    tpu.vector_store %arg11[%c0_32, %c0_33], %54 {strides = array<i32>} : memref<8x256xbf16, #tpu.memory_space<vmem>>, vector<8x256xbf16>,
    return
  }
  func.func @transform_0(%arg0: i32) -> (i32, i32) {
    %c0_i32 = arith.constant 0 : i32
    %c0_i32_0 = arith.constant 0 : i32
    return %arg0, %c0_i32 : i32, i32
  }
  func.func @transform_1(%arg0: i32) -> (i32, i32) {
    %c0_i32 = arith.constant 0 : i32
    %c0_i32_0 = arith.constant 0 : i32
    return %arg0, %c0_i32 : i32, i32
  }
  func.func @transform_2(%arg0: i32) -> (i32, i32) {
    %c0_i32 = arith.constant 0 : i32
    %c0_i32_0 = arith.constant 0 : i32
    %c0_i32_1 = arith.constant 0 : i32
    return %c0_i32, %c0_i32_0 : i32, i32
  }
  func.func @transform_3(%arg0: i32) -> (i32, i32) {
    %c0_i32 = arith.constant 0 : i32
    %c0_i32_0 = arith.constant 0 : i32
    %c0_i32_1 = arith.constant 0 : i32
    return %c0_i32, %c0_i32_0 : i32, i32
  }
  func.func @transform_4(%arg0: i32) -> (i32, i32) {
    %c0_i32 = arith.constant 0 : i32
    %c0_i32_0 = arith.constant 0 : i32
    %c0_i32_1 = arith.constant 0 : i32
    return %c0_i32, %c0_i32_0 : i32, i32
  }
  func.func @transform_5(%arg0: i32) -> (i32, i32) {
    %c0_i32 = arith.constant 0 : i32
    %c0_i32_0 = arith.constant 0 : i32
    %c0_i32_1 = arith.constant 0 : i32
    return %c0_i32, %c0_i32_0 : i32, i32
  }
  func.func @transform_6(%arg0: i32) -> (i32, i32) {
    %c0_i32 = arith.constant 0 : i32
    %c0_i32_0 = arith.constant 0 : i32
    %c0_i32_1 = arith.constant 0 : i32
    return %c0_i32, %c0_i32_0 : i32, i32
  }
  func.func @transform_7(%arg0: i32) -> (i32, i32) {
    %c0_i32 = arith.constant 0 : i32
    %c0_i32_0 = arith.constant 0 : i32
    %c0_i32_1 = arith.constant 0 : i32
    return %c0_i32, %c0_i32_0 : i32, i32
  }
  func.func @transform_8(%arg0: i32) -> (i32, i32) {
    %c0_i32 = arith.constant 0 : i32
    %c0_i32_0 = arith.constant 0 : i32
    %c0_i32_1 = arith.constant 0 : i32
    return %c0_i32, %c0_i32_0 : i32, i32
  }
  func.func @transform_9(%arg0: i32) -> (i32, i32) {
    %c0_i32 = arith.constant 0 : i32
    %c0_i32_0 = arith.constant 0 : i32
    %c0_i32_1 = arith.constant 0 : i32
    return %c0_i32, %c0_i32_0 : i32, i32
  }
  func.func @transform_10(%arg0: i32) -> (i32, i32) {
    %c0_i32 = arith.constant 0 : i32
    %c0_i32_0 = arith.constant 0 : i32
    return %arg0, %c0_i32 : i32, i32
  }
  func.func @transform_11(%arg0: i32) -> (i32, i32) {
    %c0_i32 = arith.constant 0 : i32
    %c0_i32_0 = arith.constant 0 : i32
    return %arg0, %c0_i32 : i32, i32
  }
}

</mosaic_0001>

<bundles_post_ra>
// kernel: tpu_custom_call.1
= control target key start
LH: loop header
LB: loop body
LE: loop exit
PB: predicated region body
PF: predicated region fallthrough
CT: control target
= control target key end

     0   :  { %17 = vsyncpa [#allocation3], 0  ;;  %s1360_s0 = inlined_call_operand.hbm [shape: bf16[8,256], index: 0, kind: input, shape index: {}]   ;;  %s1361_s1 = inlined_call_operand.hbm [shape: bf16[8,128], index: 1, kind: input, shape index: {}]   ;;  %s1362_s2 = inlined_call_operand.hbm [shape: bf16[256,128], index: 2, kind: input, shape index: {}]   ;;  %s1363_s3 = inlined_call_operand.vmem [shape: f32[1,128], index: 3, kind: input, shape index: {}]   ;;  %s1364_s4 = inlined_call_operand.hbm [shape: bf16[128,128], index: 4, kind: input, shape index: {}]   ;;  %s1365_s5 = inlined_call_operand.vmem [shape: f32[1,128], index: 5, kind: input, shape index: {}]   ;;  %s1366_s6 = inlined_call_operand.hbm [shape: bf16[128,128], index: 6, kind: input, shape index: {}]   ;;  %s1367_s7 = inlined_call_operand.vmem [shape: f32[1,128], index: 7, kind: input, shape index: {}]   ;;  %s1368_s8 = inlined_call_operand.hbm [shape: bf16[128,256], index: 8, kind: input, shape index: {}]   ;;  %s1369_s9 = inlined_call_operand.vmem [shape: f32[1,256], index: 9, kind: input, shape index: {}]   ;;  %s1370_s10 = inlined_call_operand.hbm [shape: bf16[8,256], index: 10, kind: output, shape index: {0}]   ;;  %s1371_s11 = inlined_call_operand.hbm [shape: f32[8,128], index: 11, kind: output, shape index: {1}]  }
   0x1   :  { %18 = vsyncpa [#allocation6], 0 }
   0x2   :  { %19 = vsyncpa [#allocation9], 0 }
   0x3   :  { %20 = vsyncpa [#allocation12], 0 }
   0x4   :  { %21 = vsyncpa [#allocation4], 0 }
   0x5   :  { %22 = vsyncpa [#allocation15], 0  ;;  %s1150_s17 = smov [#allocation5]   ;;  %s962_s21 = scalar_lea.hbm %s1361_s1, 64 }
   0x6   :  { %s39_s18 = sshll.u32 %s1150_s17, 4  ;;  %p963_p0 = scmp.ne.s32.totalorder %s1361_s1, %s962_s21  ;;  %s40_s18 = int_to_ptr.vmem [resolvable:$true] %s39_s18 }
   0x7   :  { %p966_p1 = scmp.lt.u32.totalorder %s962_s21, %s1361_s1 }
   0x9   :  { %p968_p2 = pnand %p966_p1, %p963_p0 }
   0xb   :  { %971 = shalt.err (!%p968_p2)
}
   0xc   :  { %s972_s26 = scalar_lea.vmem %s40_s18, 64  ;;  %p977_p4 = scmp.lt.s32.totalorder %s40_s18, %s40_s18 }
   0xd   :  { %p973_p3 = scmp.ne.s32.totalorder %s40_s18, %s972_s26  ;;  %p978_p5 = scmp.lt.s32.totalorder %s972_s26, %s972_s26 }
   0xf   :  { %p979_p6 = por %p978_p5, %p977_p4 }
  0x11   :  { %p980_p7 = pnand %p979_p6, %p973_p3 }
  0x13   :  { %983 = shalt.err (!%p980_p7)
}
  0x14   :  { %42 = dma.hbm_to_vmem [thread:$0]  %s1361_s1, 64, %s40_s18, [#allocation6]  }
  0x15   :  { %s1151_s29 = smov [#allocation8]   ;;  %s1152_s12 = smov [#allocation2]  }
  0x16   :  { %s62_s30 = sshll.u32 %s1151_s29, 4  ;;  %s29_s13 = sshll.u32 %s1152_s12, 4  ;;  %s63_s30 = int_to_ptr.vmem [resolvable:$true] %s62_s30  ;;  %s30_s13 = int_to_ptr.vmem [resolvable:$true] %s29_s13 }
  0x17   :  { %s984_s16 = scalar_lea.hbm %s1364_s4, 1024 }
  0x18   :  { %p985_p8 = scmp.ne.s32.totalorder %s1364_s4, %s984_s16  ;;  %p988_p9 = scmp.lt.u32.totalorder %s984_s16, %s1364_s4 }
  0x1a   :  { %p990_p10 = pnand %p988_p9, %p985_p8 }
  0x1c   :  { %993 = shalt.err (!%p990_p10)
}
  0x1d   :  { %s994_s1 = scalar_lea.vmem %s63_s30, 1024  ;;  %p999_p12 = scmp.lt.s32.totalorder %s63_s30, %s63_s30 }
  0x1e   :  { %p995_p11 = scmp.ne.s32.totalorder %s63_s30, %s994_s1  ;;  %p1000_p13 = scmp.lt.s32.totalorder %s994_s1, %s994_s1 }
  0x20   :  { %p1001_p0 = por %p1000_p13, %p999_p12 }
  0x22   :  { %p1002_p1 = pnand %p1001_p0, %p995_p11 }
  0x24   :  { %1005 = shalt.err (!%p1002_p1)
}
  0x25   :  { %s1153_s18 = smov 64   ;;  %s1154_s22 = smov 4  }
  0x26   :  { %68 = dma.hbm_to_vmem [thread:$0]  %s1364_s4, 1024, %s63_s30, [#allocation9], %s1153_s18, %s1153_s18, %s1154_s22  }
  0x27   :  { %s1006_s27 = scalar_lea.hbm %s1360_s0, 128 }
  0x28   :  { %p1007_p2 = scmp.ne.s32.totalorder %s1360_s0, %s1006_s27  ;;  %p1010_p3 = scmp.lt.u32.totalorder %s1006_s27, %s1360_s0 }
  0x2a   :  { %p1012_p4 = pnand %p1010_p3, %p1007_p2 }
  0x2c   :  { %1015 = shalt.err (!%p1012_p4)
}
  0x2d   :  { %s1016_s15 = scalar_lea.vmem %s30_s13, 128  ;;  %p1021_p6 = scmp.lt.s32.totalorder %s30_s13, %s30_s13 }
  0x2e   :  { %p1017_p5 = scmp.ne.s32.totalorder %s30_s13, %s1016_s15  ;;  %p1022_p7 = scmp.lt.s32.totalorder %s1016_s15, %s1016_s15 }
  0x30   :  { %p1023_p8 = por %p1022_p7, %p1021_p6 }
  0x32   :  { %p1024_p9 = pnand %p1023_p8, %p1017_p5 }
  0x34   :  { %1027 = shalt.err (!%p1024_p9)
}
  0x35   :  { %32 = dma.hbm_to_vmem [thread:$0]  %s1360_s0, 128, %s30_s13, [#allocation3]  }
  0x36   :  { %s1155_s16 = smov [#allocation7]   ;;  %s1156_s19 = smov [#allocation10]  }
  0x37   :  { %s48_s17 = sshll.u32 %s1155_s16, 4  ;;  %s76_s20 = sshll.u32 %s1156_s19, 4  ;;  %s49_s17 = int_to_ptr.vmem [resolvable:$true] %s48_s17  ;;  %s77_s20 = int_to_ptr.vmem [resolvable:$true] %s76_s20 }
  0x38   :  { %s1028_s23 = scalar_lea.hbm %s1362_s2, 2048 }
  0x39   :  { %p1029_p10 = scmp.ne.s32.totalorder %s1362_s2, %s1028_s23  ;;  %p1032_p11 = scmp.lt.u32.totalorder %s1028_s23, %s1362_s2 }
  0x3b   :  { %p1034_p12 = pnand %p1032_p11, %p1029_p10 }
  0x3d   :  { %1037 = shalt.err (!%p1034_p12)
}
  0x3e   :  { %s1038_s0 = scalar_lea.vmem %s49_s17, 2048  ;;  %p1043_p0 = scmp.lt.s32.totalorder %s49_s17, %s49_s17 }
  0x3f   :  { %p1039_p13 = scmp.ne.s32.totalorder %s49_s17, %s1038_s0  ;;  %p1044_p1 = scmp.lt.s32.totalorder %s1038_s0, %s1038_s0 }
  0x41   :  { %p1045_p2 = por %p1044_p1, %p1043_p0 }
  0x43   :  { %p1046_p3 = pnand %p1045_p2, %p1039_p13 }
  0x45   :  { %1049 = shalt.err (!%p1046_p3)
}
  0x46   :  { %54 = dma.hbm_to_vmem [thread:$0]  %s1362_s2, 2048, %s49_s17, [#allocation6], %s1153_s18, %s1153_s18, %s1154_s22  }
  0x47   :  { %s1050_s14 = scalar_lea.hbm %s1366_s6, 1024 }
  0x48   :  { %p1051_p4 = scmp.ne.s32.totalorder %s1366_s6, %s1050_s14  ;;  %p1054_p5 = scmp.lt.u32.totalorder %s1050_s14, %s1366_s6 }
  0x4a   :  { %p1056_p6 = pnand %p1054_p5, %p1051_p4 }
  0x4c   :  { %1059 = shalt.err (!%p1056_p6)
}
  0x4d   :  { %s1060_s19 = scalar_lea.vmem %s77_s20, 1024  ;;  %p1065_p8 = scmp.lt.s32.totalorder %s77_s20, %s77_s20 }
  0x4e   :  { %p1061_p7 = scmp.ne.s32.totalorder %s77_s20, %s1060_s19  ;;  %p1066_p9 = scmp.lt.s32.totalorder %s1060_s19, %s1060_s19 }
  0x50   :  { %p1067_p10 = por %p1066_p9, %p1065_p8 }
  0x52   :  { %p1068_p11 = pnand %p1067_p10, %p1061_p7 }
  0x54   :  { %1071 = shalt.err (!%p1068_p11)
}
  0x55   :  { %82 = dma.hbm_to_vmem [thread:$0]  %s1366_s6, 1024, %s77_s20, [#allocation9], %s1153_s18, %s1153_s18, %s1154_s22  }
  0x56   :  { %s1157_s21 = smov [#allocation11]   ;;  %s1072_s25 = scalar_lea.hbm %s1368_s8, 2048 }
  0x57   :  { %s90_s1 = sshll.u32 %s1157_s21, 4  ;;  %p1073_p12 = scmp.ne.s32.totalorder %s1368_s8, %s1072_s25  ;;  %s91_s1 = int_to_ptr.vmem [resolvable:$true] %s90_s1 }
  0x58   :  { %p1076_p13 = scmp.lt.u32.totalorder %s1072_s25, %s1368_s8 }
  0x5a   :  { %p1078_p0 = pnand %p1076_p13, %p1073_p12 }
  0x5c   :  { %1081 = shalt.err (!%p1078_p0)
}
  0x5d   :  { %s1082_s28 = scalar_lea.vmem %s91_s1, 2048  ;;  %p1087_p2 = scmp.lt.s32.totalorder %s91_s1, %s91_s1 }
  0x5e   :  { %p1083_p1 = scmp.ne.s32.totalorder %s91_s1, %s1082_s28  ;;  %p1088_p3 = scmp.lt.s32.totalorder %s1082_s28, %s1082_s28 }
  0x60   :  { %p1089_p4 = por %p1088_p3, %p1087_p2 }
  0x62   :  { %p1090_p5 = pnand %p1089_p4, %p1083_p1 }
  0x64   :  { %1093 = shalt.err (!%p1090_p5)
}
  0x65   :  { %s1158_s6 = smov 128   ;;  %s1159_s18 = smov 8  }
  0x66   :  { %96 = dma.hbm_to_vmem [thread:$0]  %s1368_s8, 2048, %s91_s1, [#allocation12], %s1158_s6, %s1158_s6, %s1159_s18  }
  0x67   :  { %1138 = dma.done.wait [#allocation3], 128  }
  0x68   :  { %1139 = vsyncadd [#allocation3], 4294967168 }
  0x69   :  { %1140 = dma.done.wait [#allocation6], 2112  }
  0x6a   :  { %1141 = vsyncadd [#allocation6], 4294965184 }
  0x6b   :  { %1142 = dma.done.wait [#allocation9], 2048  }
  0x6c   :  { %1143 = vsyncadd [#allocation9], 4294965248 }
  0x6d   :  { %1144 = dma.done.wait [#allocation12], 2048  }
  0x6e   :  { %1145 = vsyncadd [#allocation12], 4294965248  ;;  %v1160_v0 = vmov 0.0   ;;  %v894_v1 = vld [vmem:[#allocation7 + $0x40] sm:$0xff]   ;;  %v896_v3 = vld [vmem:[#allocation7 + $0x48] sm:$0xff]   ;;  %vm1161_vm0 = vmmov 0   ;;  %v415_v59 = vlaneseq }
  0x6f   :  { %839 = vmatprep.subr.bf16.mxu1 %v1160_v0  ;;  %v895_v2 = vld [vmem:[#allocation7] sm:$0xff]   ;;  %799 = vmatprep.subr.bf16.mxu0 %v894_v1  ;;  %v897_v4 = vld [vmem:[#allocation7 + $0x8] sm:$0xff]   ;;  %v898_v5 = vld [vmem:[#allocation7 + $0x50] sm:$0xff]   ;;  %s1163_s15 = smov [#allocation14]  }
  0x70   :  { %800 = vmatpush3.bf16.msra.mxu0 %v895_v2  ;;  %v899_v6 = vld [vmem:[#allocation7 + $0x10] sm:$0xff]   ;;  %v900_v7 = vld [vmem:[#allocation7 + $0x58] sm:$0xff]   ;;  %v902_v9 = vld [vmem:[#allocation7 + $0x60] sm:$0xff]   ;;  %855 = vmatprep.mubr.msk.bf16.mxu1 %vm1161_vm0, %v1160_v0  ;;  %v416_v60 = vand.u32 127, %v415_v59  ;;  %s728_s4 = sshll.u32 %s1163_s15, 4  ;;  %s729_s4 = int_to_ptr.vmem [resolvable:$true] %s728_s4 }
  0x71   :  { %801 = vmatprep.subr.bf16.mxu0 %v896_v3  ;;  %v901_v8 = vld [vmem:[#allocation7 + $0x18] sm:$0xff]   ;;  %v903_v10 = vld [vmem:[#allocation7 + $0x20] sm:$0xff]   ;;  %v904_v11 = vld [vmem:[#allocation7 + $0x68] sm:$0xff]   ;;  %s1094_s30 = scalar_lea.vmem %s729_s4, 128  ;;  %p1099_p7 = scmp.lt.s32.totalorder %s729_s4, %s729_s4 }
  0x72   :  { %v118_v12 = vld [vmem:[#allocation2] sm:$0xff]  ;;  %v912_v14 = vld [vmem:[#allocation8] sm:$0xff]   ;;  %v905_v15 = vld [vmem:[#allocation7 + $0x28] sm:$0xff]   ;;  %vm417_vm1 = vcmp.ge.s32.totalorder %v416_v60, 32  ;;  %vm418_vm2 = vcmp.lt.s32.totalorder %v416_v60, 64  ;;  %vm424_vm4 = vcmp.lt.s32.totalorder %v416_v60, 32  ;;  %p1095_p6 = scmp.ne.s32.totalorder %s729_s4, %s1094_s30  ;;  %p1100_p8 = scmp.lt.s32.totalorder %s1094_s30, %s1094_s30 }
  0x73   :  { %v746_v13 = vcombine.high %v118_v12, %v118_v12  ;;  %v906_v16 = vld [vmem:[#allocation7 + $0x70] sm:$0xff]   ;;  %840 = vmatpush3.bf16.msra.mxu1 %v912_v14  ;;  %v913_v17 = vld [vmem:[#allocation8 + $0x8] sm:$0xff]   ;;  %v908_v19 = vld [vmem:[#allocation7 + $0x78] sm:$0xff]   ;;  %v745_v23 = vcombine.low %v118_v12, %v118_v12 }
  0x74   :  { %802 = vmatpush3.bf16.msra.mxu0 %v897_v4  ;;  %v907_v18 = vld [vmem:[#allocation7 + $0x30] sm:$0xff]   ;;  %841 = vmatprep.subr.bf16.mxu1 %v1160_v0  ;;  %v909_v21 = vld [vmem:[#allocation7 + $0x38] sm:$0xff]   ;;  %v916_v24 = vld [vmem:[#allocation8 + $0x20] sm:$0xff]   ;;  %p1101_p9 = por %p1100_p8, %p1099_p7 }
  0x75   :  { %803 = vmatprep.subr.bf16.mxu0 %v898_v5  ;;  %293 = vmatprep.mubr.bf16.mxu0 %v746_v13  ;;  %v914_v20 = vld [vmem:[#allocation8 + $0x10] sm:$0xff]   ;;  %v915_v22 = vld [vmem:[#allocation8 + $0x18] sm:$0xff]   ;;  %v917_v25 = vld [vmem:[#allocation8 + $0x28] sm:$0xff]  }
  0x76   :  { %v918_v26 = vld [vmem:[#allocation8 + $0x30] sm:$0xff]   ;;  %v919_v27 = vld [vmem:[#allocation8 + $0x38] sm:$0xff]   ;;  %v920_v28 = vld [vmem:[#allocation10] sm:$0xff]   ;;  %p1102_p10 = pnand %p1101_p9, %p1095_p6 }
  0x77   :  { %842 = vmatpush3.bf16.msra.mxu1 %v913_v17  ;;  %v921_v29 = vld [vmem:[#allocation10 + $0x8] sm:$0xff]   ;;  %v744_v31 = vld [vmem:[%s1363_s3] ss:$0 sm:$0xff]  ;;  %v923_v40 = vld [vmem:[#allocation10 + $0x18] sm:$0xff]  }
  0x78   :  { %804 = vmatpush3.bf16.msra.mxu0 %v899_v6  ;;  %843 = vmatprep.subr.bf16.mxu1 %v1160_v0  ;;  %v922_v39 = vld [vmem:[#allocation10 + $0x10] sm:$0xff]   ;;  %v924_v41 = vld [vmem:[#allocation10 + $0x20] sm:$0xff]   ;;  %v925_v42 = vld [vmem:[#allocation10 + $0x28] sm:$0xff]  }
  0x79   :  { %805 = vmatprep.subr.bf16.mxu0 %v900_v7  ;;  %v926_v43 = vld [vmem:[#allocation10 + $0x30] sm:$0xff]   ;;  %v927_v44 = vld [vmem:[#allocation10 + $0x38] sm:$0xff]   ;;  %v928_v45 = vld [vmem:[#allocation11] ss:$8 sps:$4 sm:$0xff]  }
  0x7a   :  { %v930_v46 = vld [vmem:[#allocation11 + $0x4] ss:$8 sps:$4 sm:$0xff]   ;;  %v933_v47 = vld [vmem:[#allocation11 + $0x14] ss:$8 sps:$4 sm:$0xff]   ;;  %v931_v48 = vld [vmem:[#allocation11 + $0x10] ss:$8 sps:$4 sm:$0xff]  }
  0x7b   :  { %844 = vmatpush3.bf16.msra.mxu1 %v914_v20  ;;  %v936_v49 = vld [vmem:[#allocation11 + $0x24] ss:$8 sps:$4 sm:$0xff]   ;;  %v934_v50 = vld [vmem:[#allocation11 + $0x20] ss:$8 sps:$4 sm:$0xff]   ;;  %v939_v51 = vld [vmem:[#allocation11 + $0x34] ss:$8 sps:$4 sm:$0xff]  }
  0x7c   :  { %806 = vmatpush3.bf16.msra.mxu0 %v901_v8  ;;  %845 = vmatprep.subr.bf16.mxu1 %v1160_v0  ;;  %v937_v52 = vld [vmem:[#allocation11 + $0x30] ss:$8 sps:$4 sm:$0xff]   ;;  %v942_v53 = vld [vmem:[#allocation11 + $0x44] ss:$8 sps:$4 sm:$0xff]   ;;  %v940_v54 = vld [vmem:[#allocation11 + $0x40] ss:$8 sps:$4 sm:$0xff]  }
  0x7d   :  { %807 = vmatprep.subr.bf16.mxu0 %v902_v9  ;;  %v945_v55 = vld [vmem:[#allocation11 + $0x54] ss:$8 sps:$4 sm:$0xff]   ;;  %v943_v56 = vld [vmem:[#allocation11 + $0x50] ss:$8 sps:$4 sm:$0xff]   ;;  %v948_v57 = vld [vmem:[#allocation11 + $0x64] ss:$8 sps:$4 sm:$0xff]  }
  0x7e   :  { %v946_v58 = vld [vmem:[#allocation11 + $0x60] ss:$8 sps:$4 sm:$0xff]   ;;  %v763_v61 = vld [vmem:[%s1365_s5] ss:$0 sm:$0xff]  ;;  %vm419_vm3 = vmand %vm417_vm1, %vm418_vm2 }
  0x7f   :  { %846 = vmatpush3.bf16.msra.mxu1 %v915_v22  ;;  %v426_v6 = vld [vmem:[#allocation5] sm:$0xf]  ;;  %v949_v14 = vld [vmem:[#allocation11 + $0x70] ss:$8 sps:$4 sm:$0xff]  }
  0x80   :  { %808 = vmatpush3.bf16.msra.mxu0 %v903_v10  ;;  %847 = vmatprep.subr.bf16.mxu1 %v1160_v0  ;;  %v427_v7 = vunpack.c.l.bf16 %v426_v6  ;;  %v951_v13 = vld [vmem:[#allocation11 + $0x74] ss:$8 sps:$4 sm:$0xff]  }
  0x81   :  { %809 = vmatprep.subr.bf16.mxu0 %v904_v11 }
  0x83   :  { %848 = vmatpush3.bf16.msra.mxu1 %v916_v24 }
  0x84   :  { %810 = vmatpush3.bf16.msra.mxu0 %v905_v15  ;;  %849 = vmatprep.subr.bf16.mxu1 %v1160_v0  ;;  %v1162_v15 = vmov 0  }
  0x85   :  { %811 = vmatprep.subr.bf16.mxu0 %v906_v16  ;;  %v772_v16 = vld [vmem:[%s1367_s7] ss:$0 sm:$0xff] }
  0x87   :  { %850 = vmatpush3.bf16.msra.mxu1 %v917_v25 }
  0x88   :  { %812 = vmatpush3.bf16.msra.mxu0 %v907_v18  ;;  %851 = vmatprep.subr.bf16.mxu1 %v1160_v0 }
  0x89   :  { %813 = vmatprep.subr.bf16.mxu0 %v908_v19 }
  0x8b   :  { %852 = vmatpush3.bf16.msra.mxu1 %v918_v26 }
  0x8c   :  { %814 = vmatpush3.bf16.msra.mxu0 %v909_v21  ;;  %853 = vmatprep.subr.bf16.mxu1 %v1160_v0 }
  0x8d   :  { %859 = vmatprep.subr.bf16.mxu0 %v1160_v0 }
  0x8f   :  { %294 = vmatmul.mubr.bf16.vlgmr.msra.gmra.mrb[0].mxu0 %v745_v23  ;;  %854 = vmatpush3.bf16.msra.mxu1 %v919_v27 }
  0x90   :  { %875 = vmatprep.mubr.msk.bf16.mxu0 %vm1161_vm0, %v1160_v0  ;;  %860 = vmatpush3.bf16.msra.mxu0 %v920_v28 }
  0x91   :  { %861 = vmatprep.subr.bf16.mxu0 %v1160_v0  ;;  %652 = vmatprep.subr.bf16.mxu1 %v930_v46 }
  0x94   :  { %862 = vmatpush3.bf16.msra.mxu0 %v921_v29 }
  0x95   :  { %863 = vmatprep.subr.bf16.mxu0 %v1160_v0 }
  0x98   :  { %864 = vmatpush3.bf16.msra.mxu0 %v922_v39 }
  0x99   :  { %865 = vmatprep.subr.bf16.mxu0 %v1160_v0 }
  0x9c   :  { %866 = vmatpush3.bf16.msra.mxu0 %v923_v40 }
  0x9d   :  { %867 = vmatprep.subr.bf16.mxu0 %v1160_v0 }
  0xa0   :  { %868 = vmatpush3.bf16.msra.mxu0 %v924_v41 }
  0xa1   :  { %869 = vmatprep.subr.bf16.mxu0 %v1160_v0 }
  0xa4   :  { %870 = vmatpush3.bf16.msra.mxu0 %v925_v42 }
  0xa5   :  { %871 = vmatprep.subr.bf16.mxu0 %v1160_v0 }
  0xa8   :  { %872 = vmatpush3.bf16.msra.mxu0 %v926_v43 }
  0xa9   :  { %873 = vmatprep.subr.bf16.mxu0 %v1160_v0 }
  0xac   :  { %874 = vmatpush3.bf16.msra.mxu0 %v927_v44 }
 0x162   :  { %v815_v30 = vpop.f32.mrb[0].mxu0 }
 0x163   :  { %v816_v32 = vpop.f32.mrb[1].mxu0 }
 0x164   :  { %v817_v33 = vadd.f32 %v816_v32, %v815_v30  ;;  %v818_v34 = vpop.f32.mrb[2].mxu0 }
 0x165   :  { %v819_v35 = vpop.f32.mrb[3].mxu0 }
 0x166   :  { %v296_v36 = vadd.f32 %v817_v33, %v744_v31 }
 0x168   :  { %v301_v37 = vmax.f32 %v296_v36, 0.0 }
 0x16a   :  { %v302_v38 = vpack.c.bf16 %v301_v37, %v301_v37 }
 0x16c   :  { %856 = vmatmul.mubr.bf16.vlgmr.msra.gmra.mrb[0].mxu1 %v302_v38 }
 0x16d   :  { %653 = vmatpush1.bf16.msra.mxu1 %v928_v45  ;;  %684 = vmatprep.mubr.bf16.mxu1 %v1162_v15 }
 0x16e   :  { %654 = vmatprep.subr.bf16.mxu1 %v933_v47 }
 0x171   :  { %655 = vmatpush1.bf16.msra.mxu1 %v931_v48 }
 0x172   :  { %656 = vmatprep.subr.bf16.mxu1 %v936_v49 }
 0x175   :  { %657 = vmatpush1.bf16.msra.mxu1 %v934_v50 }
 0x176   :  { %658 = vmatprep.subr.bf16.mxu1 %v939_v51 }
 0x179   :  { %659 = vmatpush1.bf16.msra.mxu1 %v937_v52 }
 0x17a   :  { %660 = vmatprep.subr.bf16.mxu1 %v942_v53 }
 0x17d   :  { %661 = vmatpush1.bf16.msra.mxu1 %v940_v54 }
 0x17e   :  { %662 = vmatprep.subr.bf16.mxu1 %v945_v55 }
 0x181   :  { %663 = vmatpush1.bf16.msra.mxu1 %v943_v56 }
 0x182   :  { %664 = vmatprep.subr.bf16.mxu1 %v948_v57 }
 0x185   :  { %665 = vmatpush1.bf16.msra.mxu1 %v946_v58 }
 0x186   :  { %666 = vmatprep.subr.bf16.mxu1 %v951_v13 }
 0x189   :  { %667 = vmatpush1.bf16.msra.mxu1 %v949_v14 }
 0x23f   :  { %v408_v62 = vpop.f32.mrb[0].mxu1 }
 0x240   :  { %v409_v63 = vadd.f32 %v763_v61, %v408_v62  ;;  %v857_v0 = vpop.f32.mrb[1].mxu1 }
 0x241   :  { %v411_v1 = vpop.f32.mrb[2].mxu1 }
 0x242   :  { %v420_v2 = vsel %vm419_vm3, %v409_v63, 0.0  ;;  %414 = vst [vmem:[#allocation14] sm:$0xff] %v409_v63  ;;  %v858_v3 = vpop.f32.mrb[3].mxu1  ;;  %v425_v10 = vsel %vm424_vm4, %v409_v63, 0.0 }
 0x243   :  { %v421_v4 = vmul.f32 0.5, %v420_v2 }
 0x245   :  { %v422_v5 = vmul.f32 1.442695, %v421_v4 }
 0x247   :  { %952 = vpow2.f32 %v422_v5 }
 0x251   :  { %v953_v8 = vpop.eup %952 }
 0x252   :  { %v428_v9 = vmul.f32 %v953_v8, %v427_v7 }
 0x254   :  { %v429_v11 = vadd.f32 %v428_v9, %v425_v10 }
 0x256   :  { %v430_v12 = vpack.c.bf16 %v429_v11, %v429_v11 }
 0x258   :  { %876 = vmatmul.mubr.bf16.vlgmr.msra.gmra.mrb[4].mxu0 %v430_v12 }
 0x32b   :  { %v536_v17 = vpop.f32.mrb[4].mxu0 }
 0x32c   :  { %v537_v18 = vadd.f32 %v772_v16, %v536_v17  ;;  %v877_v19 = vpop.f32.mrb[5].mxu0 }
 0x32d   :  { %v539_v20 = vpop.f32.mrb[6].mxu0 }
 0x32e   :  { %v542_v21 = vmax.f32 %v537_v18, 0.0  ;;  %v878_v22 = vpop.f32.mrb[7].mxu0 }
 0x330   :  { %v543_v23 = vpack.c.bf16 %v542_v21, %v542_v21 }
 0x332   :  { %685 = vmatmul.mubr.bf16.vlgmr.msra.gmra.mrb[4].mxu1 %v543_v23 }
 0x333   :  { %1105 = shalt.err (!%p1102_p10)
}
 0x334   :  { %s1106_s19 = scalar_lea.hbm %s1371_s11, 128 }
 0x335   :  { %p1107_p11 = scmp.ne.s32.totalorder %s1371_s11, %s1106_s19  ;;  %p1110_p12 = scmp.lt.u32.totalorder %s1106_s19, %s1371_s11 }
 0x337   :  { %p1112_p13 = pnand %p1110_p12, %p1107_p11 }
 0x339   :  { %1115 = shalt.err (!%p1112_p13)
}
 0x33a   :  { %731 = dma.vmem_to_hbm [thread:$0]  %s729_s4, 128, %s1371_s11, [#allocation15]   ;;  %v563_v24 = vshrl.u32 %v415_v59, 7  ;;  %v560_v26 = vld [vmem:[%s1369_s9] sm:$0x3] }
 0x33b   :  { %s1164_s9 = smov [#allocation13]  }
 0x33c   :  { %v564_v25 = vsub.s32 0, %v563_v24  ;;  %v568_v27 = vsub.s32 1, %v563_v24  ;;  %s718_s11 = sshll.u32 %s1164_s9, 4  ;;  %s719_s11 = int_to_ptr.vmem [resolvable:$true] %s718_s11 }
 0x33d   :  { %s1116_s27 = scalar_lea.vmem %s719_s11, 128  ;;  %p1121_p1 = scmp.lt.s32.totalorder %s719_s11, %s719_s11 }
 0x33e   :  { %v565_v28 = vrot.slane %v560_v26, %v564_v25  ;;  %v569_v29 = vrot.slane %v560_v26, %v568_v27  ;;  %p1117_p0 = scmp.ne.s32.totalorder %s719_s11, %s1116_s27  ;;  %p1122_p2 = scmp.lt.s32.totalorder %s1116_s27, %s1116_s27 }
 0x340   :  { %p1123_p3 = por %p1122_p2, %p1121_p1 }
 0x342   :  { %p1124_p4 = pnand %p1123_p3, %p1117_p0 }
 0x405   :  { %v686_v30 = vpop.f32.mrb[4].mxu1 }
 0x406   :  { %v687_v31 = vadd.f32 %v686_v30, %v565_v28  ;;  %v688_v32 = vpop.f32.mrb[5].mxu1 }
 0x407   :  { %v689_v33 = vadd.f32 %v688_v32, %v569_v29  ;;  %v690_v34 = vpop.f32.mrb[6].mxu1 }
 0x408   :  { %v693_v35 = vsub.f32 0.0, %v687_v31  ;;  %v691_v36 = vpop.f32.mrb[7].mxu1 }
 0x409   :  { %v694_v37 = vsub.f32 0.0, %v689_v33 }
 0x40a   :  { %v695_v38 = vmul.f32 1.442695, %v693_v35 }
 0x40b   :  { %v697_v39 = vmul.f32 1.442695, %v694_v37 }
 0x40c   :  { %954 = vpow2.f32 %v695_v38 }
 0x40d   :  { %956 = vpow2.f32 %v697_v39 }
 0x416   :  { %v955_v40 = vpop.eup %954 }
 0x417   :  { %v957_v41 = vpop.eup %956  ;;  %v699_v42 = vadd.f32 1.0, %v955_v40 }
 0x418   :  { %v700_v43 = vadd.f32 1.0, %v957_v41 }
 0x419   :  { %958 = vrcp.f32 %v699_v42 }
 0x41a   :  { %960 = vrcp.f32 %v700_v43 }
 0x423   :  { %v959_v44 = vpop.eup %958 }
 0x424   :  { %v961_v45 = vpop.eup %960 }
 0x425   :  { %v798_v46 = vpack.c.bf16 %v961_v45, %v959_v44 }
 0x427   :  { %711 = vst [vmem:[#allocation13] sm:$0xff] %v798_v46 }
 0x428   :  { %1127 = shalt.err (!%p1124_p4)
}
 0x429   :  { %s1128_s28 = scalar_lea.hbm %s1370_s10, 128 }
 0x42a   :  { %p1129_p5 = scmp.ne.s32.totalorder %s1370_s10, %s1128_s28  ;;  %p1132_p6 = scmp.lt.u32.totalorder %s1128_s28, %s1370_s10 }
 0x42c   :  { %p1134_p7 = pnand %p1132_p6, %p1129_p5 }
 0x42e   :  { %1137 = shalt.err (!%p1134_p7)
}
 0x42f   :  { %721 = dma.vmem_to_hbm [thread:$0]  %s719_s11, 128, %s1370_s10, [#allocation4]  }
 0x430   :  { %1146 = dma.done.wait [#allocation4], 128  }
 0x431   :  { %1147 = vsyncadd [#allocation4], 4294967168 }
 0x432   :  { %1148 = dma.done.wait [#allocation15], 128  }
 0x433   :  { %1149 = vsyncadd [#allocation15], 4294967168 }
 0x434   :  { %738 = vsyncpa [#allocation3], 1 }
 0x435   :  { %739 = vsyncpa [#allocation6], 1 }
 0x436   :  { %740 = vsyncpa [#allocation9], 1 }
 0x437   :  { %741 = vsyncpa [#allocation12], 1 }
 0x438   :  { %742 = vsyncpa [#allocation4], 1 }
 0x439   :  { %743 = vsyncpa [#allocation15], 1 }

// kernel: tpu_custom_call.1
= control target key start
LH: loop header
LB: loop body
LE: loop exit
PB: predicated region body
PF: predicated region fallthrough
CT: control target
= control target key end

     0   :  { %17 = vsyncpa [#allocation3], 0  ;;  %s1360_s0 = inlined_call_operand.hbm [shape: bf16[8,256], index: 0, kind: input, shape index: {}]   ;;  %s1361_s1 = inlined_call_operand.hbm [shape: bf16[8,128], index: 1, kind: input, shape index: {}]   ;;  %s1362_s2 = inlined_call_operand.hbm [shape: bf16[256,128], index: 2, kind: input, shape index: {}]   ;;  %s1363_s3 = inlined_call_operand.vmem [shape: f32[1,128], index: 3, kind: input, shape index: {}]   ;;  %s1364_s4 = inlined_call_operand.hbm [shape: bf16[128,128], index: 4, kind: input, shape index: {}]   ;;  %s1365_s5 = inlined_call_operand.vmem [shape: f32[1,128], index: 5, kind: input, shape index: {}]   ;;  %s1366_s6 = inlined_call_operand.hbm [shape: bf16[128,128], index: 6, kind: input, shape index: {}]   ;;  %s1367_s7 = inlined_call_operand.vmem [shape: f32[1,128], index: 7, kind: input, shape index: {}]   ;;  %s1368_s8 = inlined_call_operand.hbm [shape: bf16[128,256], index: 8, kind: input, shape index: {}]   ;;  %s1369_s9 = inlined_call_operand.vmem [shape: f32[1,256], index: 9, kind: input, shape index: {}]   ;;  %s1370_s10 = inlined_call_operand.hbm [shape: bf16[8,256], index: 10, kind: output, shape index: {0}]   ;;  %s1371_s11 = inlined_call_operand.hbm [shape: f32[8,128], index: 11, kind: output, shape index: {1}]  }
   0x1   :  { %18 = vsyncpa [#allocation6], 0 }
   0x2   :  { %19 = vsyncpa [#allocation9], 0 }
   0x3   :  { %20 = vsyncpa [#allocation12], 0 }
   0x4   :  { %21 = vsyncpa [#allocation4], 0 }
   0x5   :  { %22 = vsyncpa [#allocation15], 0  ;;  %s1150_s17 = smov [#allocation5]   ;;  %s962_s21 = scalar_lea.hbm %s1361_s1, 64 }
   0x6   :  { %s39_s18 = sshll.u32 %s1150_s17, 4  ;;  %p963_p0 = scmp.ne.s32.totalorder %s1361_s1, %s962_s21  ;;  %s40_s18 = int_to_ptr.vmem [resolvable:$true] %s39_s18 }
   0x7   :  { %p966_p1 = scmp.lt.u32.totalorder %s962_s21, %s1361_s1 }
   0x9   :  { %p968_p2 = pnand %p966_p1, %p963_p0 }
   0xb   :  { %971 = shalt.err (!%p968_p2)
}
   0xc   :  { %s972_s26 = scalar_lea.vmem %s40_s18, 64  ;;  %p977_p4 = scmp.lt.s32.totalorder %s40_s18, %s40_s18 }
   0xd   :  { %p973_p3 = scmp.ne.s32.totalorder %s40_s18, %s972_s26  ;;  %p978_p5 = scmp.lt.s32.totalorder %s972_s26, %s972_s26 }
   0xf   :  { %p979_p6 = por %p978_p5, %p977_p4 }
  0x11   :  { %p980_p7 = pnand %p979_p6, %p973_p3 }
  0x13   :  { %983 = shalt.err (!%p980_p7)
}
  0x14   :  { %42 = dma.hbm_to_vmem [thread:$0]  %s1361_s1, 64, %s40_s18, [#allocation6]  }
  0x15   :  { %s1151_s29 = smov [#allocation8]   ;;  %s1152_s12 = smov [#allocation2]  }
  0x16   :  { %s62_s30 = sshll.u32 %s1151_s29, 4  ;;  %s29_s13 = sshll.u32 %s1152_s12, 4  ;;  %s63_s30 = int_to_ptr.vmem [resolvable:$true] %s62_s30  ;;  %s30_s13 = int_to_ptr.vmem [resolvable:$true] %s29_s13 }
  0x17   :  { %s984_s16 = scalar_lea.hbm %s1364_s4, 1024 }
  0x18   :  { %p985_p8 = scmp.ne.s32.totalorder %s1364_s4, %s984_s16  ;;  %p988_p9 = scmp.lt.u32.totalorder %s984_s16, %s1364_s4 }
  0x1a   :  { %p990_p10 = pnand %p988_p9, %p985_p8 }
  0x1c   :  { %993 = shalt.err (!%p990_p10)
}
  0x1d   :  { %s994_s1 = scalar_lea.vmem %s63_s30, 1024  ;;  %p999_p12 = scmp.lt.s32.totalorder %s63_s30, %s63_s30 }
  0x1e   :  { %p995_p11 = scmp.ne.s32.totalorder %s63_s30, %s994_s1  ;;  %p1000_p13 = scmp.lt.s32.totalorder %s994_s1, %s994_s1 }
  0x20   :  { %p1001_p0 = por %p1000_p13, %p999_p12 }
  0x22   :  { %p1002_p1 = pnand %p1001_p0, %p995_p11 }
  0x24   :  { %1005 = shalt.err (!%p1002_p1)
}
  0x25   :  { %s1153_s18 = smov 64   ;;  %s1154_s22 = smov 4  }
  0x26   :  { %68 = dma.hbm_to_vmem [thread:$0]  %s1364_s4, 1024, %s63_s30, [#allocation9], %s1153_s18, %s1153_s18, %s1154_s22  }
  0x27   :  { %s1006_s27 = scalar_lea.hbm %s1360_s0, 128 }
  0x28   :  { %p1007_p2 = scmp.ne.s32.totalorder %s1360_s0, %s1006_s27  ;;  %p1010_p3 = scmp.lt.u32.totalorder %s1006_s27, %s1360_s0 }
  0x2a   :  { %p1012_p4 = pnand %p1010_p3, %p1007_p2 }
  0x2c   :  { %1015 = shalt.err (!%p1012_p4)
}
  0x2d   :  { %s1016_s15 = scalar_lea.vmem %s30_s13, 128  ;;  %p1021_p6 = scmp.lt.s32.totalorder %s30_s13, %s30_s13 }
  0x2e   :  { %p1017_p5 = scmp.ne.s32.totalorder %s30_s13, %s1016_s15  ;;  %p1022_p7 = scmp.lt.s32.totalorder %s1016_s15, %s1016_s15 }
  0x30   :  { %p1023_p8 = por %p1022_p7, %p1021_p6 }
  0x32   :  { %p1024_p9 = pnand %p1023_p8, %p1017_p5 }
  0x34   :  { %1027 = shalt.err (!%p1024_p9)
}
  0x35   :  { %32 = dma.hbm_to_vmem [thread:$0]  %s1360_s0, 128, %s30_s13, [#allocation3]  }
  0x36   :  { %s1155_s16 = smov [#allocation7]   ;;  %s1156_s19 = smov [#allocation10]  }
  0x37   :  { %s48_s17 = sshll.u32 %s1155_s16, 4  ;;  %s76_s20 = sshll.u32 %s1156_s19, 4  ;;  %s49_s17 = int_to_ptr.vmem [resolvable:$true] %s48_s17  ;;  %s77_s20 = int_to_ptr.vmem [resolvable:$true] %s76_s20 }
  0x38   :  { %s1028_s23 = scalar_lea.hbm %s1362_s2, 2048 }
  0x39   :  { %p1029_p10 = scmp.ne.s32.totalorder %s1362_s2, %s1028_s23  ;;  %p1032_p11 = scmp.lt.u32.totalorder %s1028_s23, %s1362_s2 }
  0x3b   :  { %p1034_p12 = pnand %p1032_p11, %p1029_p10 }
  0x3d   :  { %1037 = shalt.err (!%p1034_p12)
}
  0x3e   :  { %s1038_s0 = scalar_lea.vmem %s49_s17, 2048  ;;  %p1043_p0 = scmp.lt.s32.totalorder %s49_s17, %s49_s17 }
  0x3f   :  { %p1039_p13 = scmp.ne.s32.totalorder %s49_s17, %s1038_s0  ;;  %p1044_p1 = scmp.lt.s32.totalorder %s1038_s0, %s1038_s0 }
  0x41   :  { %p1045_p2 = por %p1044_p1, %p1043_p0 }
  0x43   :  { %p1046_p3 = pnand %p1045_p2, %p1039_p13 }
  0x45   :  { %1049 = shalt.err (!%p1046_p3)
}
  0x46   :  { %54 = dma.hbm_to_vmem [thread:$0]  %s1362_s2, 2048, %s49_s17, [#allocation6], %s1153_s18, %s1153_s18, %s1154_s22  }
  0x47   :  { %s1050_s14 = scalar_lea.hbm %s1366_s6, 1024 }
  0x48   :  { %p1051_p4 = scmp.ne.s32.totalorder %s1366_s6, %s1050_s14  ;;  %p1054_p5 = scmp.lt.u32.totalorder %s1050_s14, %s1366_s6 }
  0x4a   :  { %p1056_p6 = pnand %p1054_p5, %p1051_p4 }
  0x4c   :  { %1059 = shalt.err (!%p1056_p6)
}
  0x4d   :  { %s1060_s19 = scalar_lea.vmem %s77_s20, 1024  ;;  %p1065_p8 = scmp.lt.s32.totalorder %s77_s20, %s77_s20 }
  0x4e   :  { %p1061_p7 = scmp.ne.s32.totalorder %s77_s20, %s1060_s19  ;;  %p1066_p9 = scmp.lt.s32.totalorder %s1060_s19, %s1060_s19 }
  0x50   :  { %p1067_p10 = por %p1066_p9, %p1065_p8 }
  0x52   :  { %p1068_p11 = pnand %p1067_p10, %p1061_p7 }
  0x54   :  { %1071 = shalt.err (!%p1068_p11)
}
  0x55   :  { %82 = dma.hbm_to_vmem [thread:$0]  %s1366_s6, 1024, %s77_s20, [#allocation9], %s1153_s18, %s1153_s18, %s1154_s22  }
  0x56   :  { %s1157_s21 = smov [#allocation11]   ;;  %s1072_s25 = scalar_lea.hbm %s1368_s8, 2048 }
  0x57   :  { %s90_s1 = sshll.u32 %s1157_s21, 4  ;;  %p1073_p12 = scmp.ne.s32.totalorder %s1368_s8, %s1072_s25  ;;  %s91_s1 = int_to_ptr.vmem [resolvable:$true] %s90_s1 }
  0x58   :  { %p1076_p13 = scmp.lt.u32.totalorder %s1072_s25, %s1368_s8 }
  0x5a   :  { %p1078_p0 = pnand %p1076_p13, %p1073_p12 }
  0x5c   :  { %1081 = shalt.err (!%p1078_p0)
}
  0x5d   :  { %s1082_s28 = scalar_lea.vmem %s91_s1, 2048  ;;  %p1087_p2 = scmp.lt.s32.totalorder %s91_s1, %s91_s1 }
  0x5e   :  { %p1083_p1 = scmp.ne.s32.totalorder %s91_s1, %s1082_s28  ;;  %p1088_p3 = scmp.lt.s32.totalorder %s1082_s28, %s1082_s28 }
  0x60   :  { %p1089_p4 = por %p1088_p3, %p1087_p2 }
  0x62   :  { %p1090_p5 = pnand %p1089_p4, %p1083_p1 }
  0x64   :  { %1093 = shalt.err (!%p1090_p5)
}
  0x65   :  { %s1158_s6 = smov 128   ;;  %s1159_s18 = smov 8  }
  0x66   :  { %96 = dma.hbm_to_vmem [thread:$0]  %s1368_s8, 2048, %s91_s1, [#allocation12], %s1158_s6, %s1158_s6, %s1159_s18  }
  0x67   :  { %1138 = dma.done.wait [#allocation3], 128  }
  0x68   :  { %1139 = vsyncadd [#allocation3], 4294967168 }
  0x69   :  { %1140 = dma.done.wait [#allocation6], 2112  }
  0x6a   :  { %1141 = vsyncadd [#allocation6], 4294965184 }
  0x6b   :  { %1142 = dma.done.wait [#allocation9], 2048  }
  0x6c   :  { %1143 = vsyncadd [#allocation9], 4294965248 }
  0x6d   :  { %1144 = dma.done.wait [#allocation12], 2048  }
  0x6e   :  { %1145 = vsyncadd [#allocation12], 4294965248  ;;  %v1160_v0 = vmov 0.0   ;;  %v894_v1 = vld [vmem:[#allocation7 + $0x40] sm:$0xff]   ;;  %v896_v3 = vld [vmem:[#allocation7 + $0x48] sm:$0xff]   ;;  %vm1161_vm0 = vmmov 0   ;;  %v415_v59 = vlaneseq }
  0x6f   :  { %839 = vmatprep.subr.bf16.mxu1 %v1160_v0  ;;  %v895_v2 = vld [vmem:[#allocation7] sm:$0xff]   ;;  %799 = vmatprep.subr.bf16.mxu0 %v894_v1  ;;  %v897_v4 = vld [vmem:[#allocation7 + $0x8] sm:$0xff]   ;;  %v898_v5 = vld [vmem:[#allocation7 + $0x50] sm:$0xff]   ;;  %s1163_s15 = smov [#allocation14]  }
  0x70   :  { %800 = vmatpush3.bf16.msra.mxu0 %v895_v2  ;;  %v899_v6 = vld [vmem:[#allocation7 + $0x10] sm:$0xff]   ;;  %v900_v7 = vld [vmem:[#allocation7 + $0x58] sm:$0xff]   ;;  %v902_v9 = vld [vmem:[#allocation7 + $0x60] sm:$0xff]   ;;  %855 = vmatprep.mubr.msk.bf16.mxu1 %vm1161_vm0, %v1160_v0  ;;  %v416_v60 = vand.u32 127, %v415_v59  ;;  %s728_s4 = sshll.u32 %s1163_s15, 4  ;;  %s729_s4 = int_to_ptr.vmem [resolvable:$true] %s728_s4 }
  0x71   :  { %801 = vmatprep.subr.bf16.mxu0 %v896_v3  ;;  %v901_v8 = vld [vmem:[#allocation7 + $0x18] sm:$0xff]   ;;  %v903_v10 = vld [vmem:[#allocation7 + $0x20] sm:$0xff]   ;;  %v904_v11 = vld [vmem:[#allocation7 + $0x68] sm:$0xff]   ;;  %s1094_s30 = scalar_lea.vmem %s729_s4, 128  ;;  %p1099_p7 = scmp.lt.s32.totalorder %s729_s4, %s729_s4 }
  0x72   :  { %v118_v12 = vld [vmem:[#allocation2] sm:$0xff]  ;;  %v912_v14 = vld [vmem:[#allocation8] sm:$0xff]   ;;  %v905_v15 = vld [vmem:[#allocation7 + $0x28] sm:$0xff]   ;;  %vm417_vm1 = vcmp.ge.s32.totalorder %v416_v60, 32  ;;  %vm418_vm2 = vcmp.lt.s32.totalorder %v416_v60, 64  ;;  %vm424_vm4 = vcmp.lt.s32.totalorder %v416_v60, 32  ;;  %p1095_p6 = scmp.ne.s32.totalorder %s729_s4, %s1094_s30  ;;  %p1100_p8 = scmp.lt.s32.totalorder %s1094_s30, %s1094_s30 }
  0x73   :  { %v746_v13 = vcombine.high %v118_v12, %v118_v12  ;;  %v906_v16 = vld [vmem:[#allocation7 + $0x70] sm:$0xff]   ;;  %840 = vmatpush3.bf16.msra.mxu1 %v912_v14  ;;  %v913_v17 = vld [vmem:[#allocation8 + $0x8] sm:$0xff]   ;;  %v908_v19 = vld [vmem:[#allocation7 + $0x78] sm:$0xff]   ;;  %v745_v23 = vcombine.low %v118_v12, %v118_v12 }
  0x74   :  { %802 = vmatpush3.bf16.msra.mxu0 %v897_v4  ;;  %v907_v18 = vld [vmem:[#allocation7 + $0x30] sm:$0xff]   ;;  %841 = vmatprep.subr.bf16.mxu1 %v1160_v0  ;;  %v909_v21 = vld [vmem:[#allocation7 + $0x38] sm:$0xff]   ;;  %v916_v24 = vld [vmem:[#allocation8 + $0x20] sm:$0xff]   ;;  %p1101_p9 = por %p1100_p8, %p1099_p7 }
  0x75   :  { %803 = vmatprep.subr.bf16.mxu0 %v898_v5  ;;  %293 = vmatprep.mubr.bf16.mxu0 %v746_v13  ;;  %v914_v20 = vld [vmem:[#allocation8 + $0x10] sm:$0xff]   ;;  %v915_v22 = vld [vmem:[#allocation8 + $0x18] sm:$0xff]   ;;  %v917_v25 = vld [vmem:[#allocation8 + $0x28] sm:$0xff]  }
  0x76   :  { %v918_v26 = vld [vmem:[#allocation8 + $0x30] sm:$0xff]   ;;  %v919_v27 = vld [vmem:[#allocation8 + $0x38] sm:$0xff]   ;;  %v920_v28 = vld [vmem:[#allocation10] sm:$0xff]   ;;  %p1102_p10 = pnand %p1101_p9, %p1095_p6 }
  0x77   :  { %842 = vmatpush3.bf16.msra.mxu1 %v913_v17  ;;  %v921_v29 = vld [vmem:[#allocation10 + $0x8] sm:$0xff]   ;;  %v744_v31 = vld [vmem:[%s1363_s3] ss:$0 sm:$0xff]  ;;  %v923_v40 = vld [vmem:[#allocation10 + $0x18] sm:$0xff]  }
  0x78   :  { %804 = vmatpush3.bf16.msra.mxu0 %v899_v6  ;;  %843 = vmatprep.subr.bf16.mxu1 %v1160_v0  ;;  %v922_v39 = vld [vmem:[#allocation10 + $0x10] sm:$0xff]   ;;  %v924_v41 = vld [vmem:[#allocation10 + $0x20] sm:$0xff]   ;;  %v925_v42 = vld [vmem:[#allocation10 + $0x28] sm:$0xff]  }
  0x79   :  { %805 = vmatprep.subr.bf16.mxu0 %v900_v7  ;;  %v926_v43 = vld [vmem:[#allocation10 + $0x30] sm:$0xff]   ;;  %v927_v44 = vld [vmem:[#allocation10 + $0x38] sm:$0xff]   ;;  %v928_v45 = vld [vmem:[#allocation11] ss:$8 sps:$4 sm:$0xff]  }
  0x7a   :  { %v930_v46 = vld [vmem:[#allocation11 + $0x4] ss:$8 sps:$4 sm:$0xff]   ;;  %v933_v47 = vld [vmem:[#allocation11 + $0x14] ss:$8 sps:$4 sm:$0xff]   ;;  %v931_v48 = vld [vmem:[#allocation11 + $0x10] ss:$8 sps:$4 sm:$0xff]  }
  0x7b   :  { %844 = vmatpush3.bf16.msra.mxu1 %v914_v20  ;;  %v936_v49 = vld [vmem:[#allocation11 + $0x24] ss:$8 sps:$4 sm:$0xff]   ;;  %v934_v50 = vld [vmem:[#allocation11 + $0x20] ss:$8 sps:$4 sm:$0xff]   ;;  %v939_v51 = vld [vmem:[#allocation11 + $0x34] ss:$8 sps:$4 sm:$0xff]  }
  0x7c   :  { %806 = vmatpush3.bf16.msra.mxu0 %v901_v8  ;;  %845 = vmatprep.subr.bf16.mxu1 %v1160_v0  ;;  %v937_v52 = vld [vmem:[#allocation11 + $0x30] ss:$8 sps:$4 sm:$0xff]   ;;  %v942_v53 = vld [vmem:[#allocation11 + $0x44] ss:$8 sps:$4 sm:$0xff]   ;;  %v940_v54 = vld [vmem:[#allocation11 + $0x40] ss:$8 sps:$4 sm:$0xff]  }
  0x7d   :  { %807 = vmatprep.subr.bf16.mxu0 %v902_v9  ;;  %v945_v55 = vld [vmem:[#allocation11 + $0x54] ss:$8 sps:$4 sm:$0xff]   ;;  %v943_v56 = vld [vmem:[#allocation11 + $0x50] ss:$8 sps:$4 sm:$0xff]   ;;  %v948_v57 = vld [vmem:[#allocation11 + $0x64] ss:$8 sps:$4 sm:$0xff]  }
  0x7e   :  { %v946_v58 = vld [vmem:[#allocation11 + $0x60] ss:$8 sps:$4 sm:$0xff]   ;;  %v763_v61 = vld [vmem:[%s1365_s5] ss:$0 sm:$0xff]  ;;  %vm419_vm3 = vmand %vm417_vm1, %vm418_vm2 }
  0x7f   :  { %846 = vmatpush3.bf16.msra.mxu1 %v915_v22  ;;  %v426_v6 = vld [vmem:[#allocation5] sm:$0xf]  ;;  %v949_v14 = vld [vmem:[#allocation11 + $0x70] ss:$8 sps:$4 sm:$0xff]  }
  0x80   :  { %808 = vmatpush3.bf16.msra.mxu0 %v903_v10  ;;  %847 = vmatprep.subr.bf16.mxu1 %v1160_v0  ;;  %v427_v7 = vunpack.c.l.bf16 %v426_v6  ;;  %v951_v13 = vld [vmem:[#allocation11 + $0x74] ss:$8 sps:$4 sm:$0xff]  }
  0x81   :  { %809 = vmatprep.subr.bf16.mxu0 %v904_v11 }
  0x83   :  { %848 = vmatpush3.bf16.msra.mxu1 %v916_v24 }
  0x84   :  { %810 = vmatpush3.bf16.msra.mxu0 %v905_v15  ;;  %849 = vmatprep.subr.bf16.mxu1 %v1160_v0  ;;  %v1162_v15 = vmov 0  }
  0x85   :  { %811 = vmatprep.subr.bf16.mxu0 %v906_v16  ;;  %v772_v16 = vld [vmem:[%s1367_s7] ss:$0 sm:$0xff] }
  0x87   :  { %850 = vmatpush3.bf16.msra.mxu1 %v917_v25 }
  0x88   :  { %812 = vmatpush3.bf16.msra.mxu0 %v907_v18  ;;  %851 = vmatprep.subr.bf16.mxu1 %v1160_v0 }
  0x89   :  { %813 = vmatprep.subr.bf16.mxu0 %v908_v19 }
  0x8b   :  { %852 = vmatpush3.bf16.msra.mxu1 %v918_v26 }
  0x8c   :  { %814 = vmatpush3.bf16.msra.mxu0 %v909_v21  ;;  %853 = vmatprep.subr.bf16.mxu1 %v1160_v0 }
  0x8d   :  { %859 = vmatprep.subr.bf16.mxu0 %v1160_v0 }
  0x8f   :  { %294 = vmatmul.mubr.bf16.vlgmr.msra.gmra.mrb[0].mxu0 %v745_v23  ;;  %854 = vmatpush3.bf16.msra.mxu1 %v919_v27 }
  0x90   :  { %875 = vmatprep.mubr.msk.bf16.mxu0 %vm1161_vm0, %v1160_v0  ;;  %860 = vmatpush3.bf16.msra.mxu0 %v920_v28 }
  0x91   :  { %861 = vmatprep.subr.bf16.mxu0 %v1160_v0  ;;  %652 = vmatprep.subr.bf16.mxu1 %v930_v46 }
  0x94   :  { %862 = vmatpush3.bf16.msra.mxu0 %v921_v29 }
  0x95   :  { %863 = vmatprep.subr.bf16.mxu0 %v1160_v0 }
  0x98   :  { %864 = vmatpush3.bf16.msra.mxu0 %v922_v39 }
  0x99   :  { %865 = vmatprep.subr.bf16.mxu0 %v1160_v0 }
  0x9c   :  { %866 = vmatpush3.bf16.msra.mxu0 %v923_v40 }
  0x9d   :  { %867 = vmatprep.subr.bf16.mxu0 %v1160_v0 }
  0xa0   :  { %868 = vmatpush3.bf16.msra.mxu0 %v924_v41 }
  0xa1   :  { %869 = vmatprep.subr.bf16.mxu0 %v1160_v0 }
  0xa4   :  { %870 = vmatpush3.bf16.msra.mxu0 %v925_v42 }
  0xa5   :  { %871 = vmatprep.subr.bf16.mxu0 %v1160_v0 }
  0xa8   :  { %872 = vmatpush3.bf16.msra.mxu0 %v926_v43 }
  0xa9   :  { %873 = vmatprep.subr.bf16.mxu0 %v1160_v0 }
  0xac   :  { %874 = vmatpush3.bf16.msra.mxu0 %v927_v44 }
 0x162   :  { %v815_v30 = vpop.f32.mrb[0].mxu0 }
 0x163   :  { %v816_v32 = vpop.f32.mrb[1].mxu0 }
 0x164   :  { %v817_v33 = vadd.f32 %v816_v32, %v815_v30  ;;  %v818_v34 = vpop.f32.mrb[2].mxu0 }
 0x165   :  { %v819_v35 = vpop.f32.mrb[3].mxu0 }
 0x166   :  { %v296_v36 = vadd.f32 %v817_v33, %v744_v31 }
 0x168   :  { %v301_v37 = vmax.f32 %v296_v36, 0.0 }
 0x16a   :  { %v302_v38 = vpack.c.bf16 %v301_v37, %v301_v37 }
 0x16c   :  { %856 = vmatmul.mubr.bf16.vlgmr.msra.gmra.mrb[0].mxu1 %v302_v38 }
 0x16d   :  { %653 = vmatpush1.bf16.msra.mxu1 %v928_v45  ;;  %684 = vmatprep.mubr.bf16.mxu1 %v1162_v15 }
 0x16e   :  { %654 = vmatprep.subr.bf16.mxu1 %v933_v47 }
 0x171   :  { %655 = vmatpush1.bf16.msra.mxu1 %v931_v48 }
 0x172   :  { %656 = vmatprep.subr.bf16.mxu1 %v936_v49 }
 0x175   :  { %657 = vmatpush1.bf16.msra.mxu1 %v934_v50 }
 0x176   :  { %658 = vmatprep.subr.bf16.mxu1 %v939_v51 }
 0x179   :  { %659 = vmatpush1.bf16.msra.mxu1 %v937_v52 }
 0x17a   :  { %660 = vmatprep.subr.bf16.mxu1 %v942_v53 }
 0x17d   :  { %661 = vmatpush1.bf16.msra.mxu1 %v940_v54 }
 0x17e   :  { %662 = vmatprep.subr.bf16.mxu1 %v945_v55 }
 0x181   :  { %663 = vmatpush1.bf16.msra.mxu1 %v943_v56 }
 0x182   :  { %664 = vmatprep.subr.bf16.mxu1 %v948_v57 }
 0x185   :  { %665 = vmatpush1.bf16.msra.mxu1 %v946_v58 }
 0x186   :  { %666 = vmatprep.subr.bf16.mxu1 %v951_v13 }
 0x189   :  { %667 = vmatpush1.bf16.msra.mxu1 %v949_v14 }
 0x23f   :  { %v408_v62 = vpop.f32.mrb[0].mxu1 }
 0x240   :  { %v409_v63 = vadd.f32 %v763_v61, %v408_v62  ;;  %v857_v0 = vpop.f32.mrb[1].mxu1 }
 0x241   :  { %v411_v1 = vpop.f32.mrb[2].mxu1 }
 0x242   :  { %v420_v2 = vsel %vm419_vm3, %v409_v63, 0.0  ;;  %414 = vst [vmem:[#allocation14] sm:$0xff] %v409_v63  ;;  %v858_v3 = vpop.f32.mrb[3].mxu1  ;;  %v425_v10 = vsel %vm424_vm4, %v409_v63, 0.0 }
 0x243   :  { %v421_v4 = vmul.f32 0.5, %v420_v2 }
 0x245   :  { %v422_v5 = vmul.f32 1.442695, %v421_v4 }
 0x247   :  { %952 = vpow2.f32 %v422_v5 }
 0x251   :  { %v953_v8 = vpop.eup %952 }
 0x252   :  { %v428_v9 = vmul.f32 %v953_v8, %v427_v7 }
 0x254   :  { %v429_v11 = vadd.f32 %v428_v9, %v425_v10 }
 0x256   :  { %v430_v12 = vpack.c.bf16 %v429_v11, %v429_v11 }
 0x258   :  { %876 = vmatmul.mubr.bf16.vlgmr.msra.gmra.mrb[4].mxu0 %v430_v12 }
 0x32b   :  { %v536_v17 = vpop.f32.mrb[4].mxu0 }
 0x32c   :  { %v537_v18 = vadd.f32 %v772_v16, %v536_v17  ;;  %v877_v19 = vpop.f32.mrb[5].mxu0 }
 0x32d   :  { %v539_v20 = vpop.f32.mrb[6].mxu0 }
 0x32e   :  { %v542_v21 = vmax.f32 %v537_v18, 0.0  ;;  %v878_v22 = vpop.f32.mrb[7].mxu0 }
 0x330   :  { %v543_v23 = vpack.c.bf16 %v542_v21, %v542_v21 }
 0x332   :  { %685 = vmatmul.mubr.bf16.vlgmr.msra.gmra.mrb[4].mxu1 %v543_v23 }
 0x333   :  { %1105 = shalt.err (!%p1102_p10)
}
 0x334   :  { %s1106_s19 = scalar_lea.hbm %s1371_s11, 128 }
 0x335   :  { %p1107_p11 = scmp.ne.s32.totalorder %s1371_s11, %s1106_s19  ;;  %p1110_p12 = scmp.lt.u32.totalorder %s1106_s19, %s1371_s11 }
 0x337   :  { %p1112_p13 = pnand %p1110_p12, %p1107_p11 }
 0x339   :  { %1115 = shalt.err (!%p1112_p13)
}
 0x33a   :  { %731 = dma.vmem_to_hbm [thread:$0]  %s729_s4, 128, %s1371_s11, [#allocation15]   ;;  %v563_v24 = vshrl.u32 %v415_v59, 7  ;;  %v560_v26 = vld [vmem:[%s1369_s9] sm:$0x3] }
 0x33b   :  { %s1164_s9 = smov [#allocation13]  }
 0x33c   :  { %v564_v25 = vsub.s32 0, %v563_v24  ;;  %v568_v27 = vsub.s32 1, %v563_v24  ;;  %s718_s11 = sshll.u32 %s1164_s9, 4  ;;  %s719_s11 = int_to_ptr.vmem [resolvable:$true] %s718_s11 }
 0x33d   :  { %s1116_s27 = scalar_lea.vmem %s719_s11, 128  ;;  %p1121_p1 = scmp.lt.s32.totalorder %s719_s11, %s719_s11 }
 0x33e   :  { %v565_v28 = vrot.slane %v560_v26, %v564_v25  ;;  %v569_v29 = vrot.slane %v560_v26, %v568_v27  ;;  %p1117_p0 = scmp.ne.s32.totalorder %s719_s11, %s1116_s27  ;;  %p1122_p2 = scmp.lt.s32.totalorder %s1116_s27, %s1116_s27 }
 0x340   :  { %p1123_p3 = por %p1122_p2, %p1121_p1 }
 0x342   :  { %p1124_p4 = pnand %p1123_p3, %p1117_p0 }
 0x405   :  { %v686_v30 = vpop.f32.mrb[4].mxu1 }
 0x406   :  { %v687_v31 = vadd.f32 %v686_v30, %v565_v28  ;;  %v688_v32 = vpop.f32.mrb[5].mxu1 }
 0x407   :  { %v689_v33 = vadd.f32 %v688_v32, %v569_v29  ;;  %v690_v34 = vpop.f32.mrb[6].mxu1 }
 0x408   :  { %v693_v35 = vsub.f32 0.0, %v687_v31  ;;  %v691_v36 = vpop.f32.mrb[7].mxu1 }
 0x409   :  { %v694_v37 = vsub.f32 0.0, %v689_v33 }
 0x40a   :  { %v695_v38 = vmul.f32 1.442695, %v693_v35 }
 0x40b   :  { %v697_v39 = vmul.f32 1.442695, %v694_v37 }
 0x40c   :  { %954 = vpow2.f32 %v695_v38 }
 0x40d   :  { %956 = vpow2.f32 %v697_v39 }
 0x416   :  { %v955_v40 = vpop.eup %954 }
 0x417   :  { %v957_v41 = vpop.eup %956  ;;  %v699_v42 = vadd.f32 1.0, %v955_v40 }
 0x418   :  { %v700_v43 = vadd.f32 1.0, %v957_v41 }
 0x419   :  { %958 = vrcp.f32 %v699_v42 }
 0x41a   :  { %960 = vrcp.f32 %v700_v43 }
 0x423   :  { %v959_v44 = vpop.eup %958 }
 0x424   :  { %v961_v45 = vpop.eup %960 }
 0x425   :  { %v798_v46 = vpack.c.bf16 %v961_v45, %v959_v44 }
 0x427   :  { %711 = vst [vmem:[#allocation13] sm:$0xff] %v798_v46 }
 0x428   :  { %1127 = shalt.err (!%p1124_p4)
}
 0x429   :  { %s1128_s28 = scalar_lea.hbm %s1370_s10, 128 }
 0x42a   :  { %p1129_p5 = scmp.ne.s32.totalorder %s1370_s10, %s1128_s28  ;;  %p1132_p6 = scmp.lt.u32.totalorder %s1128_s28, %s1370_s10 }
 0x42c   :  { %p1134_p7 = pnand %p1132_p6, %p1129_p5 }
 0x42e   :  { %1137 = shalt.err (!%p1134_p7)
}
 0x42f   :  { %721 = dma.vmem_to_hbm [thread:$0]  %s719_s11, 128, %s1370_s10, [#allocation4]  }
 0x430   :  { %1146 = dma.done.wait [#allocation4], 128  }
 0x431   :  { %1147 = vsyncadd [#allocation4], 4294967168 }
 0x432   :  { %1148 = dma.done.wait [#allocation15], 128  }
 0x433   :  { %1149 = vsyncadd [#allocation15], 4294967168 }
 0x434   :  { %738 = vsyncpa [#allocation3], 1 }
 0x435   :  { %739 = vsyncpa [#allocation6], 1 }
 0x436   :  { %740 = vsyncpa [#allocation9], 1 }
 0x437   :  { %741 = vsyncpa [#allocation12], 1 }
 0x438   :  { %742 = vsyncpa [#allocation4], 1 }
 0x439   :  { %743 = vsyncpa [#allocation15], 1 }

</bundles_post_ra>
